<compile_context>
chip_gen: v7x
topology: tpu7x:2x2x1
jax: 0.10.0
libtpu: 0.0.40
codegen_flags: <defaults>
</compile_context>

<pallas_src>
import math

import jax
import jax.numpy as jnp
from jax import lax
from jax.experimental import pallas as pl
from jax.experimental.pallas import tpu as pltpu

NUM_NODES = 18                       # num_AU: forward hardcodes batch = ones(18)
NHID = 32
POOL_RATIO = 0.5
K_TOP = math.ceil(POOL_RATIO * NUM_NODES)   # SAGPool keeps 9 of 18 nodes
NUM_OUT = 3
BB_C, BB_D, BB_H, BB_W = 3, 8, 16, 16        # small synthetic "video" input
SPATIAL = BB_D * BB_H * BB_W                 # 2048

# ---- parameter slab layout (rows x 128 lanes, f32; every start 8-aligned) ----
SLAB_LANES = 128
R_AHAT = 0      # (18, 18)  normalized adjacency D^-1/2 (A+I) D^-1/2
R_BB   = 24     # (18, 4)   cols 0:3 = (wbb / SPATIAL).T, col 3 = bbb.T
R_W1   = 48     # (1, 32)
R_B1   = 56     # (1, 32)
R_W2   = 64     # (32, 32)
R_B2   = 96     # (1, 32)
R_W3   = 104    # (32, 32)
R_B3   = 136    # (1, 32)
R_WS   = 144    # (32, 3)   col k = score-layer weight chunk ws[32k:32k+32]
R_BSC  = 176    # (1, 1)    score-layer bias
R_WL1  = 184    # (192, 32) lin1 weight rows 192:384 (graph-1 readout only)
R_BL1  = 376    # (1, 32)
R_WL2  = 384    # (32, 16)
R_BL2  = 416    # (1, 16)
R_WL3  = 424    # (16, 3)
R_BL3  = 440    # (1, 3)
SLAB_ROWS = 448


def gcnresnet_kernel(x_ref, p_ref, logp_ref, feat_ref):
    f32 = jnp.float32

    # --- backbone: self.features(feature) ---
    # TODO(synk): the full P3D199 3D-conv backbone is not reimplemented; a
    # global-average-pool + linear stand-in with the same (1, 18) output
    # interface is used instead.
    xsum = jnp.sum(x_ref[...], axis=1, keepdims=True)              # (3, 1)
    wbbT = p_ref[R_BB:R_BB + NUM_NODES, 0:BB_C]                    # (18, 3), 1/S folded in
    bbbT = p_ref[R_BB:R_BB + NUM_NODES, BB_C:BB_C + 1]             # (18, 1)
    x0 = jnp.dot(wbbT, xsum, preferred_element_type=f32) + bbbT    # (18, 1) = feature.T
    feat_ref[...] = x0.T                                           # (1, 18) backbone output

    A = p_ref[R_AHAT:R_AHAT + NUM_NODES, 0:NUM_NODES]              # (18, 18)

    # --- GCN layer 1: x0@w1 is rank-1 -> one MXU dot (A@x0) + VPU outer product
    w1 = p_ref[R_W1:R_W1 + 1, 0:NHID]                              # (1, 32)
    b1 = p_ref[R_B1:R_B1 + 1, 0:NHID]
    ax0 = jnp.dot(A, x0, preferred_element_type=f32)               # (18, 1)
    gcn1 = jnp.maximum(ax0 * w1 + b1, 0.0)                         # (18, 32)

    # --- GCN layers 2, 3 ---
    w2 = p_ref[R_W2:R_W2 + NHID, 0:NHID]
    b2 = p_ref[R_B2:R_B2 + 1, 0:NHID]
    gcn2 = jnp.maximum(
        jnp.dot(A, jnp.dot(gcn1, w2, preferred_element_type=f32),
                preferred_element_type=f32) + b2, 0.0)             # (18, 32)

    w3 = p_ref[R_W3:R_W3 + NHID, 0:NHID]
    b3 = p_ref[R_B3:R_B3 + 1, 0:NHID]
    gcn3 = jnp.maximum(
        jnp.dot(A, jnp.dot(gcn2, w3, preferred_element_type=f32),
                preferred_element_type=f32) + b3, 0.0)             # (18, 32)

    # --- SAGPool score layer GCNConv(96 -> 1), no (18,96) concat ---
    sw = (jnp.dot(gcn1, p_ref[R_WS:R_WS + NHID, 0:1], preferred_element_type=f32)
          + jnp.dot(gcn2, p_ref[R_WS:R_WS + NHID, 1:2], preferred_element_type=f32)
          + jnp.dot(gcn3, p_ref[R_WS:R_WS + NHID, 2:3], preferred_element_type=f32))
    bs = p_ref[R_BSC:R_BSC + 1, 0:1]                               # (1, 1)
    score = jnp.dot(A, sw, preferred_element_type=f32) + bs        # (18, 1)

    # --- top-k (k = 9) selection mask (torch.topk tie-break: earlier index wins)
    score_row = score.T                                            # (1, 18) lane-resident copy
    i_idx = lax.broadcasted_iota(jnp.int32, (NUM_NODES, NUM_NODES), 0)
    j_idx = lax.broadcasted_iota(jnp.int32, (NUM_NODES, NUM_NODES), 1)
    better = jnp.logical_or(                                       # implicit (18,18) broadcast
        score_row > score,
        jnp.logical_and(score_row == score, j_idx < i_idx))
    rank = jnp.sum(better.astype(jnp.int32), axis=1, keepdims=True)
    sel = rank < K_TOP                                             # (18, 1) bool

    # x = x[perm] * tanh(score[perm]); all selected nodes belong to graph index 1.
    # Pool each 32-wide block separately; concat only the (1,32) pooled rows.
    t = jnp.tanh(score)                                            # (18, 1)
    neg = jnp.float32(-1e30)
    inv_k = jnp.float32(1.0 / K_TOP)

    def pool_block(g):
        xs = g * t                                                 # (18, 32)
        mx = jnp.max(jnp.where(sel, xs, neg), axis=0, keepdims=True)           # gmp
        mn = jnp.sum(jnp.where(sel, xs, 0.0), axis=0, keepdims=True) * inv_k   # gap
        return mx, mn

    mx1, mn1 = pool_block(gcn1)
    mx2, mn2 = pool_block(gcn2)
    mx3, mn3 = pool_block(gcn3)

    # readout = cat([gmp, gap], 1).view(1, -1); graph 0 is empty (batch=ones(18))
    # so its 192 readout entries are zero -> only wl1[192:384, :] contributes.
    x_red = jnp.concatenate([mx1, mx2, mx3, mn1, mn2, mn3], axis=1)   # (1, 192)

    wl1 = p_ref[R_WL1:R_WL1 + 2 * 3 * NHID, 0:NHID]                # (192, 32)
    bl1 = p_ref[R_BL1:R_BL1 + 1, 0:NHID]
    fc1 = jnp.maximum(jnp.dot(x_red, wl1, preferred_element_type=f32) + bl1, 0.0)

    wl2 = p_ref[R_WL2:R_WL2 + NHID, 0:NHID // 2]
    bl2 = p_ref[R_BL2:R_BL2 + 1, 0:NHID // 2]
    fc2 = jnp.maximum(jnp.dot(fc1, wl2, preferred_element_type=f32) + bl2, 0.0)

    wl3 = p_ref[R_WL3:R_WL3 + NHID // 2, 0:NUM_OUT]
    bl3 = p_ref[R_BL3:R_BL3 + 1, 0:NUM_OUT]
    logits = jnp.dot(fc2, wl3, preferred_element_type=f32) + bl3   # (1, 3)

    # log_softmax(dim=-1)
    m = jnp.max(logits, axis=-1, keepdims=True)
    z = logits - m
    lse = jnp.log(jnp.sum(jnp.exp(z), axis=-1, keepdims=True))
    logp_ref[...] = z - lse


@jax.jit
def gcnresnet_forward(x_flat, param_slab):
    vmem = pl.BlockSpec(memory_space=pltpu.MemorySpace.VMEM)
    logp, feat = pl.pallas_call(
        gcnresnet_kernel,
        out_shape=(jax.ShapeDtypeStruct((1, NUM_OUT), jnp.float32),
                   jax.ShapeDtypeStruct((1, NUM_NODES), jnp.float32)),
        in_specs=[vmem, vmem],
        out_specs=(vmem, vmem),
        cost_estimate=pl.CostEstimate(
            flops=160_000, transcendentals=32,
            bytes_accessed=SPATIAL * BB_C * 4 + SLAB_ROWS * SLAB_LANES * 4 + 128),
    )(x_flat, param_slab)
    return logp, feat


def make_params(key):
    ks = jax.random.split(key, 16)

    def nrm(k, shape, scale=0.1):
        return (scale * jax.random.normal(k, shape)).astype(jnp.float32)

    # synthetic symmetric adjacency (stand-in for the pickled adj_file)
    upper = (jax.random.uniform(ks[0], (NUM_NODES, NUM_NODES)) < 0.3).astype(jnp.float32)
    upper = jnp.triu(upper, k=1)
    adj = upper + upper.T
    a_tilde = adj + jnp.eye(NUM_NODES, dtype=jnp.float32)            # add self loops
    deg = jnp.sum(a_tilde, axis=1)
    dinv = 1.0 / jnp.sqrt(deg)
    ahat = (dinv[:, None] * a_tilde * dinv[None, :]).astype(jnp.float32)

    params = {
        "ahat": ahat,
        # backbone stand-in (GAP + linear 3 -> 18)
        "wbb": nrm(ks[1], (BB_C, NUM_NODES), 0.5), "bbb": nrm(ks[2], (1, NUM_NODES)),
        # GCNConv(1 -> 32), (32 -> 32), (32 -> 32)
        "w1": nrm(ks[3], (1, NHID), 0.5), "b1": nrm(ks[4], (1, NHID)),
        "w2": nrm(ks[5], (NHID, NHID), 0.2), "b2": nrm(ks[6], (1, NHID)),
        "w3": nrm(ks[7], (NHID, NHID), 0.2), "b3": nrm(ks[8], (1, NHID)),
        # SAGPool score layer GCNConv(96 -> 1)
        "ws": nrm(ks[9], (3 * NHID, 1), 0.2), "bs": nrm(ks[10], (1, 1)),
        # lin1(384 -> 32), lin2(32 -> 16), lin3(16 -> 3)   (stored as (in, out))
        "wl1": nrm(ks[11], (3 * NHID * 2 * 2, NHID), 0.1), "bl1": nrm(ks[12], (1, NHID)),
        "wl2": nrm(ks[13], (NHID, NHID // 2), 0.2), "bl2": nrm(ks[14], (1, NHID // 2)),
        "wl3": nrm(ks[15], (NHID // 2, NUM_OUT), 0.2), "bl3": jnp.zeros((1, NUM_OUT), jnp.float32),
    }
    return params


def pack_params(params):
    """Pack all parameters into a single (SLAB_ROWS, 128) f32 slab."""
    slab = jnp.zeros((SLAB_ROWS, SLAB_LANES), jnp.float32)

    def put(s, row, blk):
        blk = jnp.asarray(blk, jnp.float32)
        return s.at[row:row + blk.shape[0], 0:blk.shape[1]].set(blk)

    slab = put(slab, R_AHAT, params["ahat"])
    bb = jnp.concatenate([(params["wbb"] / SPATIAL).T, params["bbb"].T], axis=1)  # (18, 4)
    slab = put(slab, R_BB, bb)
    slab = put(slab, R_W1, params["w1"])
    slab = put(slab, R_B1, params["b1"])
    slab = put(slab, R_W2, params["w2"])
    slab = put(slab, R_B2, params["b2"])
    slab = put(slab, R_W3, params["w3"])
    slab = put(slab, R_B3, params["b3"])
    slab = put(slab, R_WS, params["ws"].reshape(3, NHID).T)          # (32, 3)
    slab = put(slab, R_BSC, params["bs"])
    slab = put(slab, R_WL1, params["wl1"][2 * 3 * NHID:, :])         # graph-1 readout rows
    slab = put(slab, R_BL1, params["bl1"])
    slab = put(slab, R_WL2, params["wl2"])
    slab = put(slab, R_BL2, params["bl2"])
    slab = put(slab, R_WL3, params["wl3"])
    slab = put(slab, R_BL3, params["bl3"])
    return slab


if __name__ == "__main__":
    key = jax.random.PRNGKey(0)
    k_in, k_par = jax.random.split(key)

    # backbone input (PyTorch NCDHW video), batch must be 1 (GCNConv in_channels=1)
    feature_in = jax.random.normal(k_in, (1, BB_C, BB_D, BB_H, BB_W), jnp.float32)
    x_flat = feature_in.reshape(BB_C, SPATIAL)                       # (C, D*H*W)

    params = make_params(k_par)
    param_slab = pack_params(params)

    logp, feat = gcnresnet_forward(x_flat, param_slab)
    jax.block_until_ready((logp, feat))

    assert logp.shape == (1, NUM_OUT)
    assert feat.shape == (1, NUM_NODES)
    print("KERNEL_OK")
</pallas_src>

<mosaic_0001>
module attributes {stable_mosaic.version = 11 : i64} {
  func.func @gcnresnet_kernel(%arg0: memref<3x2048xf32, #tpu.memory_space<vmem>>, %arg1: memref<448x128xf32, #tpu.memory_space<vmem>>, %arg2: memref<1x3xf32, #tpu.memory_space<vmem>>, %arg3: memref<1x18xf32, #tpu.memory_space<vmem>>) attributes {dimension_semantics = [], scalar_prefetch = 0 : i64, scratch_operands = 0 : i64, tpu.core_type = #tpu.core_type<tc>} {
    %c0 = arith.constant 0 : index
    %c0_0 = arith.constant 0 : index
    %0 = vector.load %arg0[%c0, %c0_0] : memref<3x2048xf32, #tpu.memory_space<vmem>>, vector<3x2048xf32>
    %cst = arith.constant dense<0.000000e+00> : vector<3xf32>
    %1 = vector.multi_reduction <add>, %0, %cst [1] : vector<3x2048xf32> to vector<3xf32>
    %2 = vector.shape_cast %1 : vector<3xf32> to vector<3x1xf32>
    %c24 = arith.constant 24 : index
    %c0_1 = arith.constant 0 : index
    %3 = vector.load %arg1[%c24, %c0_1] : memref<448x128xf32, #tpu.memory_space<vmem>>, vector<18x3xf32>
    %c24_2 = arith.constant 24 : index
    %c3 = arith.constant 3 : index
    %4 = vector.load %arg1[%c24_2, %c3] : memref<448x128xf32, #tpu.memory_space<vmem>>, vector<18x1xf32>
    %cst_3 = arith.constant dense<0.000000e+00> : vector<18x1xf32>
    %5 = tpu.matmul %3, %2, %cst_3 {dimension_numbers = #tpu.dot_dimension_numbers<[1], [0], [0], [1], [0, 0, 1, 1], [], []>} : vector<18x3xf32>, vector<3x1xf32>, vector<18x1xf32> -> vector<18x1xf32>
    %6 = arith.addf %5, %4 : vector<18x1xf32>
    %7 = tpu.transpose %6, [1, 0] : vector<18x1xf32> -> vector<1x18xf32>
    %c0_4 = arith.constant 0 : index
    %c0_5 = arith.constant 0 : index
    %8 = vector.load %arg3[%c0_4, %c0_5] : memref<1x18xf32, #tpu.memory_space<vmem>>, vector<1x18xf32>
    tpu.vector_store %arg3[%c0_4, %c0_5], %7 {strides = array<i32>} : memref<1x18xf32, #tpu.memory_space<vmem>>, vector<1x18xf32>,
    %c0_6 = arith.constant 0 : index
    %c0_7 = arith.constant 0 : index
    %9 = vector.load %arg1[%c0_6, %c0_7] : memref<448x128xf32, #tpu.memory_space<vmem>>, vector<18x18xf32>
    %c48 = arith.constant 48 : index
    %c0_8 = arith.constant 0 : index
    %10 = vector.load %arg1[%c48, %c0_8] : memref<448x128xf32, #tpu.memory_space<vmem>>, vector<1x32xf32>
    %c56 = arith.constant 56 : index
    %c0_9 = arith.constant 0 : index
    %11 = vector.load %arg1[%c56, %c0_9] : memref<448x128xf32, #tpu.memory_space<vmem>>, vector<1x32xf32>
    %cst_10 = arith.constant dense<0.000000e+00> : vector<18x1xf32>
    %12 = tpu.matmul %9, %6, %cst_10 {dimension_numbers = #tpu.dot_dimension_numbers<[1], [0], [0], [1], [0, 0, 1, 1], [], []>} : vector<18x18xf32>, vector<18x1xf32>, vector<18x1xf32> -> vector<18x1xf32>
    %13 = vector.broadcast %12 : vector<18x1xf32> to vector<18x32xf32>
    %14 = vector.broadcast %10 : vector<1x32xf32> to vector<18x32xf32>
    %15 = arith.mulf %13, %14 : vector<18x32xf32>
    %16 = vector.broadcast %11 : vector<1x32xf32> to vector<18x32xf32>
    %17 = arith.addf %15, %16 : vector<18x32xf32>
    %cst_11 = arith.constant 0.000000e+00 : f32
    %18 = vector.broadcast %cst_11 : f32 to vector<18x32xf32>
    %19 = arith.maximumf %17, %18 : vector<18x32xf32>
    %c64 = arith.constant 64 : index
    %c0_12 = arith.constant 0 : index
    %20 = vector.load %arg1[%c64, %c0_12] : memref<448x128xf32, #tpu.memory_space<vmem>>, vector<32x32xf32>
    %c96 = arith.constant 96 : index
    %c0_13 = arith.constant 0 : index
    %21 = vector.load %arg1[%c96, %c0_13] : memref<448x128xf32, #tpu.memory_space<vmem>>, vector<1x32xf32>
    %cst_14 = arith.constant dense<0.000000e+00> : vector<18x32xf32>
    %22 = tpu.matmul %19, %20, %cst_14 {dimension_numbers = #tpu.dot_dimension_numbers<[1], [0], [0], [1], [0, 0, 1, 1], [], []>} : vector<18x32xf32>, vector<32x32xf32>, vector<18x32xf32> -> vector<18x32xf32>
    %cst_15 = arith.constant dense<0.000000e+00> : vector<18x32xf32>
    %23 = tpu.matmul %9, %22, %cst_15 {dimension_numbers = #tpu.dot_dimension_numbers<[1], [0], [0], [1], [0, 0, 1, 1], [], []>} : vector<18x18xf32>, vector<18x32xf32>, vector<18x32xf32> -> vector<18x32xf32>
    %24 = vector.broadcast %21 : vector<1x32xf32> to vector<18x32xf32>
    %25 = arith.addf %23, %24 : vector<18x32xf32>
    %cst_16 = arith.constant 0.000000e+00 : f32
    %26 = vector.broadcast %cst_16 : f32 to vector<18x32xf32>
    %27 = arith.maximumf %25, %26 : vector<18x32xf32>
    %c104 = arith.constant 104 : index
    %c0_17 = arith.constant 0 : index
    %28 = vector.load %arg1[%c104, %c0_17] : memref<448x128xf32, #tpu.memory_space<vmem>>, vector<32x32xf32>
    %c136 = arith.constant 136 : index
    %c0_18 = arith.constant 0 : index
    %29 = vector.load %arg1[%c136, %c0_18] : memref<448x128xf32, #tpu.memory_space<vmem>>, vector<1x32xf32>
    %cst_19 = arith.constant dense<0.000000e+00> : vector<18x32xf32>
    %30 = tpu.matmul %27, %28, %cst_19 {dimension_numbers = #tpu.dot_dimension_numbers<[1], [0], [0], [1], [0, 0, 1, 1], [], []>} : vector<18x32xf32>, vector<32x32xf32>, vector<18x32xf32> -> vector<18x32xf32>
    %cst_20 = arith.constant dense<0.000000e+00> : vector<18x32xf32>
    %31 = tpu.matmul %9, %30, %cst_20 {dimension_numbers = #tpu.dot_dimension_numbers<[1], [0], [0], [1], [0, 0, 1, 1], [], []>} : vector<18x18xf32>, vector<18x32xf32>, vector<18x32xf32> -> vector<18x32xf32>
    %32 = vector.broadcast %29 : vector<1x32xf32> to vector<18x32xf32>
    %33 = arith.addf %31, %32 : vector<18x32xf32>
    %cst_21 = arith.constant 0.000000e+00 : f32
    %34 = vector.broadcast %cst_21 : f32 to vector<18x32xf32>
    %35 = arith.maximumf %33, %34 : vector<18x32xf32>
    %c144 = arith.constant 144 : index
    %c0_22 = arith.constant 0 : index
    %36 = vector.load %arg1[%c144, %c0_22] : memref<448x128xf32, #tpu.memory_space<vmem>>, vector<32x1xf32>
    %cst_23 = arith.constant dense<0.000000e+00> : vector<18x1xf32>
    %37 = tpu.matmul %19, %36, %cst_23 {dimension_numbers = #tpu.dot_dimension_numbers<[1], [0], [0], [1], [0, 0, 1, 1], [], []>} : vector<18x32xf32>, vector<32x1xf32>, vector<18x1xf32> -> vector<18x1xf32>
    %c144_24 = arith.constant 144 : index
    %c1 = arith.constant 1 : index
    %38 = vector.load %arg1[%c144_24, %c1] : memref<448x128xf32, #tpu.memory_space<vmem>>, vector<32x1xf32>
    %cst_25 = arith.constant dense<0.000000e+00> : vector<18x1xf32>
    %39 = tpu.matmul %27, %38, %cst_25 {dimension_numbers = #tpu.dot_dimension_numbers<[1], [0], [0], [1], [0, 0, 1, 1], [], []>} : vector<18x32xf32>, vector<32x1xf32>, vector<18x1xf32> -> vector<18x1xf32>
    %40 = arith.addf %37, %39 : vector<18x1xf32>
    %c144_26 = arith.constant 144 : index
    %c2 = arith.constant 2 : index
    %41 = vector.load %arg1[%c144_26, %c2] : memref<448x128xf32, #tpu.memory_space<vmem>>, vector<32x1xf32>
    %cst_27 = arith.constant dense<0.000000e+00> : vector<18x1xf32>
    %42 = tpu.matmul %35, %41, %cst_27 {dimension_numbers = #tpu.dot_dimension_numbers<[1], [0], [0], [1], [0, 0, 1, 1], [], []>} : vector<18x32xf32>, vector<32x1xf32>, vector<18x1xf32> -> vector<18x1xf32>
    %43 = arith.addf %40, %42 : vector<18x1xf32>
    %c176 = arith.constant 176 : index
    %c0_28 = arith.constant 0 : index
    %44 = vector.load %arg1[%c176, %c0_28] : memref<448x128xf32, #tpu.memory_space<vmem>>, vector<1x1xf32>
    %cst_29 = arith.constant dense<0.000000e+00> : vector<18x1xf32>
    %45 = tpu.matmul %9, %43, %cst_29 {dimension_numbers = #tpu.dot_dimension_numbers<[1], [0], [0], [1], [0, 0, 1, 1], [], []>} : vector<18x18xf32>, vector<18x1xf32>, vector<18x1xf32> -> vector<18x1xf32>
    %46 = vector.broadcast %44 : vector<1x1xf32> to vector<18x1xf32>
    %47 = arith.addf %45, %46 : vector<18x1xf32>
    %48 = tpu.transpose %47, [1, 0] : vector<18x1xf32> -> vector<1x18xf32>
    %49 = tpu.iota {dimensions = array<i32: 0>} : vector<18x18xi32>
    %50 = tpu.iota {dimensions = array<i32: 1>} : vector<18x18xi32>
    %51 = vector.broadcast %48 : vector<1x18xf32> to vector<18x18xf32>
    %52 = vector.broadcast %47 : vector<18x1xf32> to vector<18x18xf32>
    %53 = arith.cmpf ogt, %51, %52 : vector<18x18xf32>
    %54 = vector.broadcast %48 : vector<1x18xf32> to vector<18x18xf32>
    %55 = vector.broadcast %47 : vector<18x1xf32> to vector<18x18xf32>
    %56 = arith.cmpf oeq, %54, %55 : vector<18x18xf32>
    %57 = arith.cmpi slt, %50, %49 : vector<18x18xi32>
    %58 = arith.andi %56, %57 : vector<18x18xi1>
    %59 = arith.ori %53, %58 : vector<18x18xi1>
    %60 = arith.extui %59 : vector<18x18xi1> to vector<18x18xi32>
    %cst_30 = arith.constant dense<0> : vector<18xi32>
    %61 = vector.multi_reduction <add>, %60, %cst_30 [1] : vector<18x18xi32> to vector<18xi32>
    %62 = vector.shape_cast %61 : vector<18xi32> to vector<18x1xi32>
    %c9_i32 = arith.constant 9 : i32
    %63 = vector.broadcast %c9_i32 : i32 to vector<18x1xi32>
    %64 = arith.cmpi slt, %62, %63 : vector<18x1xi32>
    %65 = math.tanh %47 : vector<18x1xf32>
    %66 = vector.broadcast %65 : vector<18x1xf32> to vector<18x32xf32>
    %67 = arith.mulf %19, %66 : vector<18x32xf32>
    %cst_31 = arith.constant -1.000000e+30 : f32
    %68 = vector.shape_cast %64 : vector<18x1xi1> to vector<18x1xi1>
    %69 = vector.broadcast %68 : vector<18x1xi1> to vector<18x32xi1>
    %70 = vector.broadcast %cst_31 : f32 to vector<18x32xf32>
    %71 = arith.select %69, %67, %70 : vector<18x32xi1>, vector<18x32xf32>
    %cst_32 = arith.constant dense<0xFF800000> : vector<32xf32>
    %72 = vector.multi_reduction <maximumf>, %71, %cst_32 [0] : vector<18x32xf32> to vector<32xf32>
    %73 = vector.shape_cast %72 : vector<32xf32> to vector<1x32xf32>
    %cst_33 = arith.constant 0.000000e+00 : f32
    %74 = vector.shape_cast %64 : vector<18x1xi1> to vector<18x1xi1>
    %75 = vector.broadcast %74 : vector<18x1xi1> to vector<18x32xi1>
    %76 = vector.broadcast %cst_33 : f32 to vector<18x32xf32>
    %77 = arith.select %75, %67, %76 : vector<18x32xi1>, vector<18x32xf32>
    %cst_34 = arith.constant dense<0.000000e+00> : vector<32xf32>
    %78 = vector.multi_reduction <add>, %77, %cst_34 [0] : vector<18x32xf32> to vector<32xf32>
    %79 = vector.shape_cast %78 : vector<32xf32> to vector<1x32xf32>
    %cst_35 = arith.constant 0.111111112 : f32
    %80 = vector.broadcast %cst_35 : f32 to vector<1x32xf32>
    %81 = arith.mulf %79, %80 : vector<1x32xf32>
    %82 = vector.broadcast %65 : vector<18x1xf32> to vector<18x32xf32>
    %83 = arith.mulf %27, %82 : vector<18x32xf32>
    %cst_36 = arith.constant -1.000000e+30 : f32
    %84 = vector.shape_cast %64 : vector<18x1xi1> to vector<18x1xi1>
    %85 = vector.broadcast %84 : vector<18x1xi1> to vector<18x32xi1>
    %86 = vector.broadcast %cst_36 : f32 to vector<18x32xf32>
    %87 = arith.select %85, %83, %86 : vector<18x32xi1>, vector<18x32xf32>
    %cst_37 = arith.constant dense<0xFF800000> : vector<32xf32>
    %88 = vector.multi_reduction <maximumf>, %87, %cst_37 [0] : vector<18x32xf32> to vector<32xf32>
    %89 = vector.shape_cast %88 : vector<32xf32> to vector<1x32xf32>
    %cst_38 = arith.constant 0.000000e+00 : f32
    %90 = vector.shape_cast %64 : vector<18x1xi1> to vector<18x1xi1>
    %91 = vector.broadcast %90 : vector<18x1xi1> to vector<18x32xi1>
    %92 = vector.broadcast %cst_38 : f32 to vector<18x32xf32>
    %93 = arith.select %91, %83, %92 : vector<18x32xi1>, vector<18x32xf32>
    %cst_39 = arith.constant dense<0.000000e+00> : vector<32xf32>
    %94 = vector.multi_reduction <add>, %93, %cst_39 [0] : vector<18x32xf32> to vector<32xf32>
    %95 = vector.shape_cast %94 : vector<32xf32> to vector<1x32xf32>
    %cst_40 = arith.constant 0.111111112 : f32
    %96 = vector.broadcast %cst_40 : f32 to vector<1x32xf32>
    %97 = arith.mulf %95, %96 : vector<1x32xf32>
    %98 = vector.broadcast %65 : vector<18x1xf32> to vector<18x32xf32>
    %99 = arith.mulf %35, %98 : vector<18x32xf32>
    %cst_41 = arith.constant -1.000000e+30 : f32
    %100 = vector.shape_cast %64 : vector<18x1xi1> to vector<18x1xi1>
    %101 = vector.broadcast %100 : vector<18x1xi1> to vector<18x32xi1>
    %102 = vector.broadcast %cst_41 : f32 to vector<18x32xf32>
    %103 = arith.select %101, %99, %102 : vector<18x32xi1>, vector<18x32xf32>
    %cst_42 = arith.constant dense<0xFF800000> : vector<32xf32>
    %104 = vector.multi_reduction <maximumf>, %103, %cst_42 [0] : vector<18x32xf32> to vector<32xf32>
    %105 = vector.shape_cast %104 : vector<32xf32> to vector<1x32xf32>
    %cst_43 = arith.constant 0.000000e+00 : f32
    %106 = vector.shape_cast %64 : vector<18x1xi1> to vector<18x1xi1>
    %107 = vector.broadcast %106 : vector<18x1xi1> to vector<18x32xi1>
    %108 = vector.broadcast %cst_43 : f32 to vector<18x32xf32>
    %109 = arith.select %107, %99, %108 : vector<18x32xi1>, vector<18x32xf32>
    %cst_44 = arith.constant dense<0.000000e+00> : vector<32xf32>
    %110 = vector.multi_reduction <add>, %109, %cst_44 [0] : vector<18x32xf32> to vector<32xf32>
    %111 = vector.shape_cast %110 : vector<32xf32> to vector<1x32xf32>
    %cst_45 = arith.constant 0.111111112 : f32
    %112 = vector.broadcast %cst_45 : f32 to vector<1x32xf32>
    %113 = arith.mulf %111, %112 : vector<1x32xf32>
    %114 = tpu.concatenate %73, %89, %105, %81, %97, %113 in 1 : vector<1x32xf32>, vector<1x32xf32>, vector<1x32xf32>, vector<1x32xf32>, vector<1x32xf32>, vector<1x32xf32> -> vector<1x192xf32>
    %c184 = arith.constant 184 : index
    %c0_46 = arith.constant 0 : index
    %115 = vector.load %arg1[%c184, %c0_46] : memref<448x128xf32, #tpu.memory_space<vmem>>, vector<192x32xf32>
    %c376 = arith.constant 376 : index
    %c0_47 = arith.constant 0 : index
    %116 = vector.load %arg1[%c376, %c0_47] : memref<448x128xf32, #tpu.memory_space<vmem>>, vector<1x32xf32>
    %cst_48 = arith.constant dense<0.000000e+00> : vector<1x32xf32>
    %117 = tpu.matmul %114, %115, %cst_48 {dimension_numbers = #tpu.dot_dimension_numbers<[1], [0], [0], [1], [0, 0, 1, 1], [], []>} : vector<1x192xf32>, vector<192x32xf32>, vector<1x32xf32> -> vector<1x32xf32>
    %118 = arith.addf %117, %116 : vector<1x32xf32>
    %cst_49 = arith.constant 0.000000e+00 : f32
    %119 = vector.broadcast %cst_49 : f32 to vector<1x32xf32>
    %120 = arith.maximumf %118, %119 : vector<1x32xf32>
    %c384 = arith.constant 384 : index
    %c0_50 = arith.constant 0 : index
    %121 = vector.load %arg1[%c384, %c0_50] : memref<448x128xf32, #tpu.memory_space<vmem>>, vector<32x16xf32>
    %c416 = arith.constant 416 : index
    %c0_51 = arith.constant 0 : index
    %122 = vector.load %arg1[%c416, %c0_51] : memref<448x128xf32, #tpu.memory_space<vmem>>, vector<1x16xf32>
    %cst_52 = arith.constant dense<0.000000e+00> : vector<1x16xf32>
    %123 = tpu.matmul %120, %121, %cst_52 {dimension_numbers = #tpu.dot_dimension_numbers<[1], [0], [0], [1], [0, 0, 1, 1], [], []>} : vector<1x32xf32>, vector<32x16xf32>, vector<1x16xf32> -> vector<1x16xf32>
    %124 = arith.addf %123, %122 : vector<1x16xf32>
    %cst_53 = arith.constant 0.000000e+00 : f32
    %125 = vector.broadcast %cst_53 : f32 to vector<1x16xf32>
    %126 = arith.maximumf %124, %125 : vector<1x16xf32>
    %c424 = arith.constant 424 : index
    %c0_54 = arith.constant 0 : index
    %127 = vector.load %arg1[%c424, %c0_54] : memref<448x128xf32, #tpu.memory_space<vmem>>, vector<16x3xf32>
    %c440 = arith.constant 440 : index
    %c0_55 = arith.constant 0 : index
    %128 = vector.load %arg1[%c440, %c0_55] : memref<448x128xf32, #tpu.memory_space<vmem>>, vector<1x3xf32>
    %cst_56 = arith.constant dense<0.000000e+00> : vector<1x3xf32>
    %129 = tpu.matmul %126, %127, %cst_56 {dimension_numbers = #tpu.dot_dimension_numbers<[1], [0], [0], [1], [0, 0, 1, 1], [], []>} : vector<1x16xf32>, vector<16x3xf32>, vector<1x3xf32> -> vector<1x3xf32>
    %130 = arith.addf %129, %128 : vector<1x3xf32>
    %cst_57 = arith.constant dense<0xFF800000> : vector<1xf32>
    %131 = vector.multi_reduction <maximumf>, %130, %cst_57 [1] : vector<1x3xf32> to vector<1xf32>
    %132 = vector.shape_cast %131 : vector<1xf32> to vector<1x1xf32>
    %133 = vector.broadcast %132 : vector<1x1xf32> to vector<1x3xf32>
    %134 = arith.subf %130, %133 : vector<1x3xf32>
    %135 = math.exp %134 : vector<1x3xf32>
    %cst_58 = arith.constant dense<0.000000e+00> : vector<1xf32>
    %136 = vector.multi_reduction <add>, %135, %cst_58 [1] : vector<1x3xf32> to vector<1xf32>
    %137 = vector.shape_cast %136 : vector<1xf32> to vector<1x1xf32>
    %138 = math.log %137 : vector<1x1xf32>
    %139 = vector.broadcast %138 : vector<1x1xf32> to vector<1x3xf32>
    %140 = arith.subf %134, %139 : vector<1x3xf32>
    %c0_59 = arith.constant 0 : index
    %c0_60 = arith.constant 0 : index
    %141 = vector.load %arg2[%c0_59, %c0_60] : memref<1x3xf32, #tpu.memory_space<vmem>>, vector<1x3xf32>
    tpu.vector_store %arg2[%c0_59, %c0_60], %140 {strides = array<i32>} : memref<1x3xf32, #tpu.memory_space<vmem>>, vector<1x3xf32>,
    return
  }
}

</mosaic_0001>

<bundles_post_ra>
// kernel: gcnresnet_forward.1
= control target key start
LH: loop header
LB: loop body
LE: loop exit
PB: predicated region body
PF: predicated region fallthrough
CT: control target
= control target key end

     0   :  { %9 = vsyncpa [#allocation3], 0  ;;  %s2621_s0 = inlined_call_operand.hbm [shape: f32[3,2048], index: 0, kind: input, shape index: {}]   ;;  %s2622_s1 = inlined_call_operand.hbm [shape: f32[448,128], index: 1, kind: input, shape index: {}]   ;;  %s2623_s2 = inlined_call_operand.hbm [shape: f32[1,3], index: 2, kind: output, shape index: {0}]   ;;  %s2624_s3 = inlined_call_operand.hbm [shape: f32[1,18], index: 3, kind: output, shape index: {1}]  }
   0x1   :  { %10 = vsyncpa [#allocation6], 0 }
   0x2   :  { %11 = vsyncpa [#allocation4], 0 }
   0x3   :  { %12 = vsyncpa [#allocation9], 0  ;;  %s2221_s12 = smov [#allocation2]   ;;  %s2222_s14 = smov [#allocation5]  }
   0x4   :  { %s19_s13 = sshll.u32 %s2221_s12, 4  ;;  %s28_s15 = sshll.u32 %s2222_s14, 4  ;;  %s20_s13 = int_to_ptr.vmem [resolvable:$true] %s19_s13  ;;  %s2257_s15 = int_to_ptr.vmem [resolvable:$true] %s28_s15 }
   0x5   :  { %s2125_s18 = scalar_lea.hbm %s2621_s0, 1024 }
   0x6   :  { %p2126_p0 = scmp.ne.s32.totalorder %s2621_s0, %s2125_s18  ;;  %p2129_p1 = scmp.lt.u32.totalorder %s2125_s18, %s2621_s0 }
   0x8   :  { %p2131_p2 = pnand %p2129_p1, %p2126_p0 }
   0xa   :  { %2134 = shalt.err (!%p2131_p2)
}
   0xb   :  { %s2135_s23 = scalar_lea.vmem %s20_s13, 1024  ;;  %p2140_p4 = scmp.lt.s32.totalorder %s20_s13, %s20_s13 }
   0xc   :  { %p2136_p3 = scmp.ne.s32.totalorder %s20_s13, %s2135_s23  ;;  %p2141_p5 = scmp.lt.s32.totalorder %s2135_s23, %s2135_s23 }
   0xe   :  { %p2142_p6 = por %p2141_p5, %p2140_p4 }
  0x10   :  { %p2143_p7 = pnand %p2142_p6, %p2136_p3 }
  0x12   :  { %2146 = shalt.err (!%p2143_p7)
}
  0x13   :  { %22 = dma.hbm_to_vmem [thread:$0]  %s2621_s0, 1024, %s20_s13, [#allocation3]  }
  0x14   :  { %s2147_s28 = scalar_lea.hbm %s2622_s1, 7168 }
  0x15   :  { %p2148_p8 = scmp.ne.s32.totalorder %s2622_s1, %s2147_s28  ;;  %p2151_p9 = scmp.lt.u32.totalorder %s2147_s28, %s2622_s1 }
  0x17   :  { %p2153_p10 = pnand %p2151_p9, %p2148_p8 }
  0x19   :  { %2156 = shalt.err (!%p2153_p10)
}
  0x1a   :  { %s2157_s6 = scalar_lea.vmem %s2257_s15, 7168  ;;  %p2162_p12 = scmp.lt.s32.totalorder %s2257_s15, %s2257_s15 }
  0x1b   :  { %p2158_p11 = scmp.ne.s32.totalorder %s2257_s15, %s2157_s6  ;;  %p2163_p13 = scmp.lt.s32.totalorder %s2157_s6, %s2157_s6 }
  0x1d   :  { %p2164_p0 = por %p2163_p13, %p2162_p12 }
  0x1f   :  { %p2165_p1 = pnand %p2164_p0, %p2158_p11 }
  0x21   :  { %2168 = shalt.err (!%p2165_p1)
}
  0x22   :  { %s2223_s0 = smov 128   ;;  %s2224_s7 = smov 8  }
  0x23   :  { %34 = dma.hbm_to_vmem [thread:$0]  %s2622_s1, 7168, %s2257_s15, [#allocation6], %s2223_s0, %s2223_s0, %s2224_s7  }
  0x24   :  { %2213 = dma.done.wait [#allocation3], 1024  }
  0x25   :  { %2214 = vsyncadd [#allocation3], 4294966272 }
  0x26   :  { %2215 = dma.done.wait [#allocation6], 7168  }
  0x27   :  { %2216 = vsyncadd [#allocation6], 4294960128  ;;  %v2225_v0 = vmov 0.0   ;;  %vm73_vm0 = vcmask 1042432   ;;  %v41_v1 = vld [vmem:[#allocation2] sm:$0x77] }
  0x28   :  { %1792 = vmatprep.subr.mxu0 %v2225_v0  ;;  %v42_v2 = vld [vmem:[#allocation2 + $0x8] sm:$0x77]  ;;  %v57_v3 = vcombine.high %v41_v1, %v41_v1  ;;  %v43_v5 = vld [vmem:[#allocation2 + $0x10] sm:$0x77]  ;;  %v74_v6 = vsel %vm73_vm0, %v41_v1, 0.0  ;;  %vm2625_vm1 = vmmov 0  }
  0x29   :  { %v58_v4 = vcombine.high %v42_v2, %v42_v2  ;;  %v77_v8 = vsel %vm73_vm0, %v42_v2, 0.0  ;;  %v59_v10 = vcombine.high %v43_v5, %v43_v5  ;;  %v44_v12 = vld [vmem:[#allocation2 + $0x18] sm:$0x77]  ;;  %v81_v14 = vsel %vm73_vm0, %v43_v5, 0.0  ;;  %v45_v18 = vld [vmem:[#allocation2 + $0x20] sm:$0x77]  ;;  %1794 = vmatprep.mubr.msk.f32.mxu0 %vm2625_vm1, %v2225_v0  ;;  %1812 = vmatprep.mubr.msk.f32.mxu1 %vm2625_vm1, %v2225_v0 }
  0x2a   :  { %v75_v7 = vsel %vm73_vm0, %v57_v3, 0.0  ;;  %v60_v16 = vcombine.high %v44_v12, %v44_v12  ;;  %v85_v20 = vsel %vm73_vm0, %v44_v12, 0.0  ;;  %v61_v22 = vcombine.high %v45_v18, %v45_v18  ;;  %v46_v24 = vld [vmem:[#allocation2 + $0x28] sm:$0x77]  ;;  %v47_v30 = vld [vmem:[#allocation2 + $0x30] sm:$0x77] }
  0x2b   :  { %v76_v9 = vadd.f32 %v75_v7, %v74_v6  ;;  %v79_v11 = vsel %vm73_vm0, %v58_v4, 0.0  ;;  %v83_v17 = vsel %vm73_vm0, %v59_v10, 0.0  ;;  %v89_v26 = vsel %vm73_vm0, %v45_v18, 0.0  ;;  %v48_v36 = vld [vmem:[#allocation2 + $0x38] sm:$0x77]  ;;  %v108_v49 = vld [vmem:[#allocation5 + $0x20] sm:$0xff] }
  0x2c   :  { %v87_v23 = vsel %vm73_vm0, %v60_v16, 0.0  ;;  %v62_v28 = vcombine.high %v46_v24, %v46_v24  ;;  %v91_v29 = vsel %vm73_vm0, %v61_v22, 0.0  ;;  %v93_v32 = vsel %vm73_vm0, %v46_v24, 0.0  ;;  %v107_v48 = vld [vmem:[#allocation5 + $0x18] sm:$0xff]  ;;  %s2227_s1 = smov 125   ;;  %v2330_v4 = vld [vmem:[#allocation5] sm:$0xff] }
  0x2d   :  { %v78_v13 = vadd.f32 %v77_v8, %v76_v9  ;;  %v63_v34 = vcombine.high %v47_v30, %v47_v30  ;;  %v97_v38 = vsel %vm73_vm0, %v47_v30, 0.0  ;;  %v64_v40 = vcombine.high %v48_v36, %v48_v36  ;;  %115 = vrot.lane.b32.xlu1 %v108_v49, %s2227_s1  ;;  %v109_v50 = vld [vmem:[#allocation5 + $0x28] sm:$0x3]  ;;  %v2344_v6 = vld [vmem:[#allocation5 + $0x10] sm:$0x3]  ;;  %v377_v7 = vld [vmem:[#allocation5 + $0x40] sm:$0xff] }
  0x2e   :  { %v95_v35 = vsel %vm73_vm0, %v62_v28, 0.0  ;;  %v101_v43 = vsel %vm73_vm0, %v48_v36, 0.0  ;;  %vm122_vm2 = vcmask 23552   ;;  %v2228_v52 = vmov 0.0|0.0   ;;  %v2332_v5 = vld [vmem:[#allocation5 + $0x8] sm:$0xff]  ;;  %s2230_s10 = smov 127  }
  0x2f   :  { %v80_v15 = vadd.f32 %v79_v11, %v78_v13  ;;  %v99_v41 = vsel %vm73_vm0, %v63_v34, 0.0  ;;  %v103_v45 = vsel %vm73_vm0, %v64_v40, 0.0  ;;  %2053 = vmatprep.subr.bf16.mxu1 %v2228_v52  ;;  %v2229_v53 = vmov 0   ;;  %v378_v8 = vld [vmem:[#allocation5 + $0x48] sm:$0xff]  ;;  %v2376_v34 = vld [vmem:[#allocation5 + $0x98] sm:$0xff]  ;;  %s2231_s11 = smov 126  }
  0x30   :  { %2085 = vset.pattern.permute.xlu1 %v2229_v53  ;;  %2106 = vset.pattern.permute.xlu0 %v2229_v53  ;;  %vm261_vm3 = vcmask 1041408   ;;  %vm251_vm4 = vcmask 146432   ;;  %v1970_v9 = vpack.c.bf16 %v378_v8, %v377_v7  ;;  %vm2626_vm5 = vcmask 261120   ;;  %s2232_s12 = smov 32   ;;  %s2233_s13 = smov 64  }
  0x31   :  { %v82_v19 = vadd.f32 %v81_v14, %v80_v15  ;;  %117 = vrot.lane.b32.xlu1 %v109_v50, %s2227_s1  ;;  %v379_v14 = vld [vmem:[#allocation5 + $0x50] sm:$0xff]  ;;  %v380_v15 = vld [vmem:[#allocation5 + $0x58] sm:$0xff]  ;;  %s2234_s14 = smov 96   ;;  %s2235_s15 = smov [#allocation8]  }
  0x32   :  { %v1973_v16 = vpack.c.bf16 %v380_v15, %v379_v14  ;;  %s1664_s16 = sshll.u32 %s2235_s15, 4  ;;  %s1665_s16 = int_to_ptr.vmem [resolvable:$true] %s1664_s16 }
  0x33   :  { %v84_v21 = vadd.f32 %v83_v17, %v82_v19  ;;  %v1686_v19 = vld [vmem:[#allocation5 + $0x30] ss:$0 sm:$0xff]  ;;  %s2169_s17 = scalar_lea.vmem %s1665_s16, 16  ;;  %s2173_s18 = scalar_lea.vmem %s1665_s16, 32 }
  0x34   :  { %p2170_p2 = scmp.ne.s32.totalorder %s1665_s16, %s2169_s17  ;;  %p2174_p3 = scmp.lt.s32.totalorder %s1665_s16, %s1665_s16 }
  0x35   :  { %v86_v25 = vadd.f32 %v85_v20, %v84_v21  ;;  %v1687_v20 = vld [vmem:[#allocation5 + $0x38] ss:$0 sm:$0xff]  ;;  %p2175_p4 = scmp.lt.s32.totalorder %s2173_s18, %s2169_s17 }
  0x37   :  { %v88_v27 = vadd.f32 %v87_v23, %v86_v25  ;;  %p2176_p5 = por %p2175_p4, %p2174_p3 }
  0x39   :  { %v90_v31 = vadd.f32 %v89_v26, %v88_v27  ;;  %p2177_p6 = pnand %p2176_p5, %p2170_p2 }
  0x3b   :  { %v92_v33 = vadd.f32 %v91_v29, %v90_v31 }
  0x3d   :  { %v94_v37 = vadd.f32 %v93_v32, %v92_v33  ;;  %v2374_v33 = vld [vmem:[#allocation5 + $0x90] sm:$0xff] }
  0x3e   :  { %v2382_v36 = vpack.i.bf16 %v2376_v34, %v2374_v33 }
  0x3f   :  { %v96_v39 = vadd.f32 %v95_v35, %v94_v37  ;;  %v2378_v35 = vld [vmem:[#allocation5 + $0xa0] sm:$0xff]  ;;  %v2384_v37 = vld [vmem:[#allocation5 + $0xa8] sm:$0xff] }
  0x41   :  { %v98_v42 = vadd.f32 %v97_v38, %v96_v39  ;;  %v562_v38 = vld [vmem:[#allocation5 + $0x68] sm:$0xff]  ;;  %v563_v39 = vld [vmem:[#allocation5 + $0x70] sm:$0xff] }
  0x42   :  { %v1979_v40 = vpack.c.bf16 %v563_v39, %v562_v38  ;;  %v1699_v38 = vld [vmem:[#allocation5 + $0x88] ss:$0 sm:$0xff] }
  0x43   :  { %v100_v44 = vadd.f32 %v99_v41, %v98_v42  ;;  %v2389_v41 = vpack.i.bf16 %v2384_v37, %v2378_v35 }
  0x45   :  { %v102_v46 = vadd.f32 %v101_v43, %v100_v44 }
  0x47   :  { %v104_v47 = vadd.f32 %v103_v45, %v102_v46 }
  0x49   :  { %105 = vadd.xlane.f32.xlu0 %v104_v47 }
  0x5f   :  { %113 = vrot.lane.b32.xlu0 %v107_v48, %s2227_s1 }
  0x63   :  { %2097 = vrot.lane.b32.xlu0 %v2382_v36, %s2231_s11 }
  0x9f   :  { %v116_v57 = vpop.permute.xlu1 %115 }
  0xa3   :  { %v118_v62 = vpop.permute.xlu1 %117 }
  0xd6   :  { %v106_v51 = vpop.xlane.xlu0 %105 }
  0xd7   :  { %1793 = vmatpush3.msk.msra.mxu0 %vm73_vm0, %v106_v51 }
  0xd8   :  { %1795 = vmatmul.mubr.msk.f32.vlgmr.msra.gmra.mrb[0].mxu0 %vm122_vm2, %v107_v48  ;;  %1966 = vmatprep.subr.bf16.mxu0 %v2228_v52 }
  0xd9   :  { %1797 = vmatprep.mubr.msk.f32.mxu0 %vm2625_vm1, %v2225_v0 }
  0xda   :  { %v114_v56 = vpop.permute.xlu0 %113 }
  0xdc   :  { %1798 = vmatmul.mubr.msk.f32.gmra.mrb[2].mxu0 %vm122_vm2, %v108_v49  ;;  %v564_v49 = vld [vmem:[#allocation5 + $0x78] sm:$0xff] }
  0xdd   :  { %1800 = vmatprep.mubr.msk.f32.mxu0 %vm2625_vm1, %v2225_v0 }
  0xe0   :  { %1801 = vmatmul.mubr.msk.f32.gmra.mrb[4].mxu0 %vm122_vm2, %v109_v50  ;;  %v565_v50 = vld [vmem:[#allocation5 + $0x80] sm:$0xff] }
  0xe1   :  { %1809 = vmatprep.mubr.msk.f32.mxu0 %vm2625_vm1, %v2225_v0  ;;  %v1982_v51 = vpack.c.bf16 %v565_v50, %v564_v49 }
 0x1ab   :  { %v198_v54 = vpop.f32.mrb[0].mxu0 }
 0x1ac   :  { %v1796_v55 = vpop.f32.mrb[1].mxu0  ;;  %v2320_v59 = vadd.f32 %v198_v54, %v114_v56 }
 0x1ad   :  { %v1691_v55 = vld [vmem:[#allocation5 + $0x60] ss:$0 sm:$0xff] }
 0x1af   :  { %v203_v58 = vpop.f32.mrb[2].mxu0 }
 0x1b0   :  { %v2322_v60 = vadd.f32 %v203_v58, %v116_v57  ;;  %v1799_v61 = vpop.f32.mrb[3].mxu0 }
 0x1b2   :  { %v1967_v63 = vpack.c.bf16 %v2322_v60, %v2320_v59 }
 0x1b3   :  { %v208_v1 = vpop.f32.mrb[4].mxu0 }
 0x1b4   :  { %1968 = vmatpush3.bf16.msra.mxu0 %v1967_v63  ;;  %2055 = vmatpush3.bf16.msra.mxu1 %v1967_v63  ;;  %v2326_v2 = vadd.f32 %v208_v1, %v118_v62  ;;  %v1802_v3 = vpop.f32.mrb[5].mxu0 }
 0x1b5   :  { %1807 = vmatprep.subr.mxu0 %v2225_v0  ;;  %2054 = vmatprep.subr.mxu1 %v2225_v0 }
 0x1b8   :  { %1808 = vmatpush3.msk.msra.mxu0 %vm261_vm3, %v2326_v2  ;;  %2056 = vmatpush3.msk.msra.mxu1 %vm261_vm3, %v2326_v2 }
 0x1b9   :  { %1810 = vmatmul.mubr.msk.f32.vlgmr.msra.gmra.mrb[6].mxu0 %vm251_vm4, %v2330_v4  ;;  %1813 = vmatmul.mubr.msk.f32.vlgmr.msra.gmra.mrb[0].mxu1 %vm251_vm4, %v2332_v5 }
 0x1ba   :  { %1815 = vmatprep.mubr.msk.f32.mxu1 %vm2625_vm1, %v2225_v0  ;;  %1969 = vmatprep.subr.bf16.mxu0 %v2228_v52 }
 0x1bb   :  { %1826 = vmatprep.mubr.msk.f32.mxu0 %vm2625_vm1, %v2225_v0  ;;  %1975 = vmatprep.subr.bf16.mxu1 %v2228_v52 }
 0x1bc   :  { %1971 = vmatpush3.bf16.msra.mxu0 %v1970_v9 }
 0x1bd   :  { %1816 = vmatmul.mubr.msk.f32.gmra.mrb[2].mxu1 %vm251_vm4, %v2344_v6  ;;  %1972 = vmatprep.subr.bf16.mxu0 %v2228_v52 }
 0x1be   :  { %1841 = vmatprep.mubr.msk.f32.mxu1 %vm2625_vm1, %v2225_v0 }
 0x1c0   :  { %1974 = vmatpush3.bf16.msra.mxu0 %v1973_v16 }
 0x1c1   :  { %1978 = vmatprep.subr.bf16.mxu0 %v2228_v52 }
 0x28c   :  { %v331_v10 = vpop.f32.mrb[6].mxu0  ;;  %v336_v11 = vpop.f32.mrb[0].mxu1 }
 0x28d   :  { %347 = vperm.xlu1 %2085, %v331_v10   ;;  %v1811_v12 = vpop.f32.mrb[7].mxu0  ;;  %v1814_v13 = vpop.f32.mrb[1].mxu1 }
 0x290   :  { %v341_v17 = vpop.f32.mrb[2].mxu1 }
 0x291   :  { %352 = vperm.xlu1 %2085, %v336_v11   ;;  %v1817_v18 = vpop.f32.mrb[3].mxu1 }
 0x292   :  { %v1994_v18 = vpack.c.bf16 %v2376_v34, %v2374_v33 }
 0x295   :  { %357 = vperm.xlu1 %2085, %v341_v17  }
 0x299   :  { %2087 = vrot.lane.b32.xlu1 %v2382_v36, %s2230_s10 }
 0x29d   :  { %2092 = vrot.lane.b32.xlu1 %v2389_v41, %s2230_s10 }
 0x2a1   :  { %2102 = vrot.lane.b32.xlu1 %v2389_v41, %s2231_s11 }
 0x30c   :  { %v348_v21 = vpop.permute.xlu1 %347 }
 0x30d   :  { %v364_v22 = vmul.f32 %v1686_v19, %v348_v21 }
 0x30f   :  { %v371_v23 = vadd.f32 %v1687_v20, %v364_v22 }
 0x310   :  { %v353_v24 = vpop.permute.xlu1 %352 }
 0x311   :  { %v2356_v25 = vmax.f32 %v371_v23, 0.0  ;;  %v365_v26 = vmul.f32 %v1686_v19, %v353_v24 }
 0x313   :  { %v372_v27 = vadd.f32 %v1687_v20, %v365_v26  ;;  %1827 = vmatmul.mubr.msk.f32.vlgmr.msra.gmra.mrb[8].mxu0 %vm2626_vm5, %v2356_v25 }
 0x314   :  { %v358_v28 = vpop.permute.xlu1 %357  ;;  %1829 = vmatprep.mubr.msk.f32.mxu0 %vm2625_vm1, %v2225_v0  ;;  %1980 = vmatpush3.bf16.msra.mxu0 %v1979_v40 }
 0x315   :  { %v2362_v29 = vmax.f32 %v372_v27, 0.0  ;;  %v366_v30 = vmul.f32 %v1686_v19, %v358_v28  ;;  %1981 = vmatprep.subr.bf16.mxu0 %v2228_v52  ;;  %v1997_v19 = vpack.c.bf16 %v2384_v37, %v2378_v35  ;;  %v2098_v27 = vpop.permute.xlu0 %2097 }
 0x317   :  { %v373_v31 = vadd.f32 %v1687_v20, %v366_v30  ;;  %1830 = vmatmul.mubr.msk.f32.gmra.mrb[10].mxu0 %vm2626_vm5, %v2362_v29  ;;  %v2100_v30 = vunpack.i.h.bf16 %v2098_v27 }
 0x318   :  { %1832 = vmatprep.mubr.msk.f32.mxu0 %vm2625_vm1, %v2225_v0  ;;  %1983 = vmatpush3.bf16.msra.mxu0 %v1982_v51  ;;  %v2088_v54 = vpop.permute.xlu1 %2087 }
 0x319   :  { %v2368_v32 = vmax.f32 %v373_v31, 0.0  ;;  %1987 = vmatprep.subr.bf16.mxu0 %v2228_v52  ;;  %v2090_v56 = vunpack.i.h.bf16 %v2088_v54  ;;  %v2089_v57 = vunpack.i.l.bf16 %v2088_v54  ;;  %v2099_v31 = vunpack.i.l.bf16 %v2098_v27 }
 0x31b   :  { %1833 = vmatmul.mubr.msk.f32.gmra.mrb[12].mxu0 %vm2626_vm5, %v2368_v32  ;;  %v1988_v1 = vpack.c.bf16 %v2090_v56, %v2089_v57  ;;  %v2000_v36 = vpack.c.bf16 %v2100_v30, %v2099_v31 }
 0x31c   :  { %1858 = vmatprep.mubr.msk.f32.mxu0 %vm2625_vm1, %v2225_v0  ;;  %v2093_v58 = vpop.permute.xlu1 %2092 }
 0x31d   :  { %v2095_v3 = vunpack.i.h.bf16 %v2093_v58  ;;  %v2094_v7 = vunpack.i.l.bf16 %v2093_v58 }
 0x31f   :  { %v1991_v12 = vpack.c.bf16 %v2095_v3, %v2094_v7 }
 0x320   :  { %v2103_v33 = vpop.permute.xlu1 %2102 }
 0x321   :  { %v2105_v34 = vunpack.i.h.bf16 %v2103_v33  ;;  %v2104_v35 = vunpack.i.l.bf16 %v2103_v33 }
 0x323   :  { %v2003_v37 = vpack.c.bf16 %v2105_v34, %v2104_v35 }
 0x3e6   :  { %v458_v42 = vpop.f32.mrb[8].mxu0 }
 0x3e7   :  { %v1828_v43 = vpop.f32.mrb[9].mxu0 }
 0x3ea   :  { %v463_v44 = vpop.f32.mrb[10].mxu0 }
 0x3eb   :  { %v1976_v45 = vpack.c.bf16 %v463_v44, %v458_v42  ;;  %v1831_v46 = vpop.f32.mrb[11].mxu0 }
 0x3ed   :  { %1977 = vmatpush3.bf16.msra.mxu1 %v1976_v45 }
 0x3ee   :  { %v468_v47 = vpop.f32.mrb[12].mxu0  ;;  %1839 = vmatprep.subr.mxu1 %v2225_v0 }
 0x3ef   :  { %v1834_v48 = vpop.f32.mrb[13].mxu0 }
 0x3f1   :  { %1840 = vmatpush3.msk.msra.mxu1 %vm261_vm3, %v468_v47 }
 0x3f2   :  { %1842 = vmatmul.mubr.msk.f32.vlgmr.msra.gmra.mrb[4].mxu1 %vm251_vm4, %v2330_v4  ;;  %1984 = vmatprep.subr.bf16.mxu1 %v2228_v52 }
 0x3f3   :  { %1844 = vmatprep.mubr.msk.f32.mxu1 %vm2625_vm1, %v2225_v0 }
 0x3f6   :  { %1845 = vmatmul.mubr.msk.f32.gmra.mrb[6].mxu1 %vm251_vm4, %v2332_v5 }
 0x3f7   :  { %1847 = vmatprep.mubr.msk.f32.mxu1 %vm2625_vm1, %v2225_v0 }
 0x3fa   :  { %1848 = vmatmul.mubr.msk.f32.gmra.mrb[8].mxu1 %vm251_vm4, %v2344_v6 }
 0x3fb   :  { %1873 = vmatprep.mubr.msk.f32.mxu1 %vm2625_vm1, %v2225_v0 }
 0x4c5   :  { %v545_v61 = vpop.f32.mrb[4].mxu1 }
 0x4c6   :  { %v546_v62 = vadd.f32 %v1691_v55, %v545_v61  ;;  %v1843_v63 = vpop.f32.mrb[5].mxu1 }
 0x4c8   :  { %v2409_v8 = vmax.f32 %v546_v62, 0.0  ;;  %v1713_v62 = vld [vmem:[#allocation5 + $0xb0] ss:$0 sm:$0xff] }
 0x4c9   :  { %v550_v9 = vpop.f32.mrb[6].mxu1 }
 0x4ca   :  { %v551_v10 = vadd.f32 %v1691_v55, %v550_v9  ;;  %v1846_v11 = vpop.f32.mrb[7].mxu1  ;;  %1859 = vmatmul.mubr.msk.f32.vlgmr.msra.gmra.mrb[14].mxu0 %vm2626_vm5, %v2409_v8 }
 0x4cb   :  { %1861 = vmatprep.mubr.msk.f32.mxu0 %vm2625_vm1, %v2225_v0  ;;  %1989 = vmatpush3.bf16.msra.mxu0 %v1988_v1 }
 0x4cc   :  { %v2415_v13 = vmax.f32 %v551_v10, 0.0  ;;  %1990 = vmatprep.subr.bf16.mxu0 %v2228_v52 }
 0x4cd   :  { %v555_v14 = vpop.f32.mrb[8].mxu1 }
 0x4ce   :  { %v556_v15 = vadd.f32 %v1691_v55, %v555_v14  ;;  %1862 = vmatmul.mubr.msk.f32.gmra.mrb[16].mxu0 %vm2626_vm5, %v2415_v13  ;;  %v1849_v16 = vpop.f32.mrb[9].mxu1 }
 0x4cf   :  { %1864 = vmatprep.mubr.msk.f32.mxu0 %vm2625_vm1, %v2225_v0  ;;  %1992 = vmatpush3.bf16.msra.mxu0 %v1991_v12 }
 0x4d0   :  { %v2422_v17 = vmax.f32 %v556_v15, 0.0  ;;  %1993 = vmatprep.subr.bf16.mxu0 %v2228_v52 }
 0x4d2   :  { %1865 = vmatmul.mubr.msk.f32.gmra.mrb[18].mxu0 %vm2626_vm5, %v2422_v17 }
 0x4d3   :  { %1890 = vmatprep.mubr.msk.f32.mxu0 %vm2625_vm1, %v2225_v0 }
 0x4d6   :  { %1891 = vmatmul.mubr.msk.f32.vlgmr.msra.gmra.mrb[20].mxu0 %vm2626_vm5, %v2409_v8 }
 0x4d7   :  { %1893 = vmatprep.mubr.msk.f32.mxu0 %vm2625_vm1, %v2225_v0  ;;  %1995 = vmatpush3.bf16.msra.mxu0 %v1994_v18 }
 0x4d8   :  { %1996 = vmatprep.subr.bf16.mxu0 %v2228_v52 }
 0x4da   :  { %1894 = vmatmul.mubr.msk.f32.gmra.mrb[22].mxu0 %vm2626_vm5, %v2415_v13 }
 0x4db   :  { %1896 = vmatprep.mubr.msk.f32.mxu0 %vm2625_vm1, %v2225_v0  ;;  %1998 = vmatpush3.bf16.msra.mxu0 %v1997_v19 }
 0x4dc   :  { %1999 = vmatprep.subr.bf16.mxu0 %v2228_v52 }
 0x4de   :  { %1897 = vmatmul.mubr.msk.f32.gmra.mrb[24].mxu0 %vm2626_vm5, %v2422_v17 }
 0x4df   :  { %1907 = vmatprep.mubr.msk.f32.mxu0 %vm2625_vm1, %v2225_v0 }
 0x4e2   :  { %1908 = vmatmul.mubr.msk.f32.vlgmr.msra.gmra.mrb[20].mxu0 %vm2626_vm5, %v2356_v25 }
 0x4e3   :  { %1910 = vmatprep.mubr.msk.f32.mxu0 %vm2625_vm1, %v2225_v0  ;;  %2001 = vmatpush3.bf16.msra.mxu0 %v2000_v36 }
 0x4e4   :  { %2002 = vmatprep.subr.bf16.mxu0 %v2228_v52 }
 0x4e6   :  { %1911 = vmatmul.mubr.msk.f32.gmra.mrb[22].mxu0 %vm2626_vm5, %v2362_v29 }
 0x4e7   :  { %1913 = vmatprep.mubr.msk.f32.mxu0 %vm2625_vm1, %v2225_v0  ;;  %2004 = vmatpush3.bf16.msra.mxu0 %v2003_v37 }
 0x4e8   :  { %2044 = vmatprep.subr.bf16.mxu0 %v2228_v52 }
 0x4ea   :  { %1914 = vmatmul.mubr.msk.f32.gmra.mrb[24].mxu0 %vm2626_vm5, %v2368_v32 }
 0x4eb   :  { %1924 = vmatprep.mubr.msk.f32.mxu0 %vm2625_vm1, %v2225_v0 }
 0x59d   :  { %v642_v20 = vpop.f32.mrb[14].mxu0 }
 0x59e   :  { %v1860_v21 = vpop.f32.mrb[15].mxu0 }
 0x5a1   :  { %v647_v22 = vpop.f32.mrb[16].mxu0 }
 0x5a2   :  { %v1985_v23 = vpack.c.bf16 %v647_v22, %v642_v20  ;;  %v1863_v24 = vpop.f32.mrb[17].mxu0 }
 0x5a4   :  { %1986 = vmatpush3.bf16.msra.mxu1 %v1985_v23 }
 0x5a5   :  { %v652_v26 = vpop.f32.mrb[18].mxu0  ;;  %1871 = vmatprep.subr.mxu1 %v2225_v0 }
 0x5a6   :  { %v1866_v28 = vpop.f32.mrb[19].mxu0 }
 0x5a8   :  { %1872 = vmatpush3.msk.msra.mxu1 %vm261_vm3, %v652_v26 }
 0x5a9   :  { %1874 = vmatmul.mubr.msk.f32.vlgmr.msra.gmra.mrb[10].mxu1 %vm251_vm4, %v2330_v4  ;;  %2005 = vmatprep.subr.bf16.mxu1 %v2228_v52 }
 0x5aa   :  { %1876 = vmatprep.mubr.msk.f32.mxu1 %vm2625_vm1, %v2225_v0 }
 0x5ad   :  { %1877 = vmatmul.mubr.msk.f32.gmra.mrb[12].mxu1 %vm251_vm4, %v2332_v5 }
 0x5ae   :  { %1879 = vmatprep.mubr.msk.f32.mxu1 %vm2625_vm1, %v2225_v0 }
 0x5b1   :  { %1880 = vmatmul.mubr.msk.f32.gmra.mrb[14].mxu1 %vm251_vm4, %v2344_v6 }
 0x5b2   :  { %1939 = vmatprep.mubr.msk.f32.mxu1 %vm2625_vm1, %v2225_v0 }
 0x67c   :  { %v729_v39 = vpop.f32.mrb[10].mxu1 }
 0x67d   :  { %v2478_v40 = vadd.f32 %v1699_v38, %v729_v39  ;;  %v1875_v41 = vpop.f32.mrb[11].mxu1 }
 0x67f   :  { %v743_v42 = vmax.f32 %v2478_v40, 0.0 }
 0x680   :  { %v734_v43 = vpop.f32.mrb[12].mxu1 }
 0x681   :  { %v2481_v44 = vadd.f32 %v1699_v38, %v734_v43  ;;  %v1878_v45 = vpop.f32.mrb[13].mxu1  ;;  %1925 = vmatmul.mubr.msk.f32.vlgmr.msra.gmra.mrb[20].mxu0 %vm2626_vm5, %v743_v42 }
 0x682   :  { %1927 = vmatprep.mubr.msk.f32.mxu0 %vm2625_vm1, %v2225_v0 }
 0x683   :  { %v744_v46 = vmax.f32 %v2481_v44, 0.0 }
 0x684   :  { %v739_v47 = vpop.f32.mrb[14].mxu1 }
 0x685   :  { %v2489_v48 = vadd.f32 %v1699_v38, %v739_v47  ;;  %1928 = vmatmul.mubr.msk.f32.gmra.mrb[22].mxu0 %vm2626_vm5, %v744_v46  ;;  %v1881_v49 = vpop.f32.mrb[15].mxu1 }
 0x686   :  { %1930 = vmatprep.mubr.msk.f32.mxu0 %vm2625_vm1, %v2225_v0 }
 0x687   :  { %v745_v50 = vmax.f32 %v2489_v48, 0.0 }
 0x689   :  { %1931 = vmatmul.mubr.msk.f32.gmra.mrb[24].mxu0 %vm2626_vm5, %v745_v50 }
 0x68a   :  { %1956 = vmatprep.mubr.msk.f32.mxu0 %vm2625_vm1, %v2225_v0 }
 0x754   :  { %v1013_v51 = vpop.f32.mrb[20].mxu0 }
 0x755   :  { %v1926_v54 = vpop.f32.mrb[21].mxu0 }
 0x758   :  { %v1018_v55 = vpop.f32.mrb[22].mxu0 }
 0x759   :  { %v2006_v56 = vpack.c.bf16 %v1018_v55, %v1013_v51  ;;  %v1929_v57 = vpop.f32.mrb[23].mxu0 }
 0x75a   :  { %v1380_v57 = vld [vmem:[#allocation5 + $0xc0] sm:$0xff] }
 0x75b   :  { %2007 = vmatpush3.bf16.msra.mxu1 %v2006_v56  ;;  %v1379_v56 = vld [vmem:[#allocation5 + $0xb8] sm:$0xff] }
 0x75c   :  { %v1023_v58 = vpop.f32.mrb[24].mxu0  ;;  %1937 = vmatprep.subr.mxu1 %v2225_v0 }
 0x75d   :  { %v1932_v61 = vpop.f32.mrb[25].mxu0 }
 0x75e   :  { %v2009_v61 = vpack.c.bf16 %v1380_v57, %v1379_v56 }
 0x75f   :  { %1938 = vmatpush3.msk.msra.mxu1 %vm261_vm3, %v1023_v58  ;;  %v1381_v58 = vld [vmem:[#allocation5 + $0xc8] sm:$0xff] }
 0x760   :  { %1940 = vmatmul.mubr.msk.f32.vlgmr.msra.gmra.mrb[16].mxu1 %vm251_vm4, %v2330_v4  ;;  %2008 = vmatprep.subr.bf16.mxu1 %v2228_v52 }
 0x761   :  { %1942 = vmatprep.mubr.msk.f32.mxu1 %vm2625_vm1, %v2225_v0  ;;  %2010 = vmatpush1.bf16.msra.mxu1 %v2009_v61 }
 0x762   :  { %2011 = vmatprep.subr.bf16.mxu1 %v2228_v52 }
 0x764   :  { %1943 = vmatmul.mubr.msk.f32.gmra.mrb[18].mxu1 %vm251_vm4, %v2332_v5  ;;  %v1150_v5 = vlaneseq }
 0x765   :  { %1945 = vmatprep.mubr.msk.f32.mxu1 %vm2625_vm1, %v2225_v0 }
 0x766   :  { %v1151_v14 = vshrl.u32 %v1150_v5, 7  ;;  %v1155_v15 = vand.u32 127, %v1150_v5  ;;  %v1389_v5 = vld [vmem:[#allocation5 + $0x108] sm:$0xff] }
 0x768   :  { %1946 = vmatmul.mubr.msk.f32.gmra.mrb[20].mxu1 %vm251_vm4, %v2344_v6  ;;  %v1153_v16 = vadd.s32 16, %v1151_v14  ;;  %v1158_v18 = vsub.s32 0, %v1151_v14  ;;  %v1152_v19 = vadd.s32 8, %v1151_v14  ;;  %vm1181_vm11 = vcmp.lt.s32.totalorder %v1155_v15, %v1151_v14  ;;  %v1390_v14 = vld [vmem:[#allocation5 + $0x110] sm:$0xff] }
 0x76a   :  { %vm1183_vm6 = vcmp.lt.s32.totalorder %v1155_v15, %v1153_v16  ;;  %vm1182_vm7 = vcmp.lt.s32.totalorder %v1155_v15, %v1152_v19  ;;  %v2024_v15 = vpack.c.bf16 %v1390_v14, %v1389_v5  ;;  %v1391_v16 = vld [vmem:[#allocation5 + $0x118] sm:$0xff]  ;;  %v1393_v19 = vld [vmem:[#allocation5 + $0x128] sm:$0xff] }
 0x833   :  { %v1104_v63 = vpop.f32.mrb[16].mxu1 }
 0x834   :  { %v1105_v1 = vadd.f32 %v1713_v62, %v1104_v63  ;;  %v1941_v3 = vpop.f32.mrb[17].mxu1  ;;  %v1383_v63 = vld [vmem:[#allocation5 + $0xd8] sm:$0xff] }
 0x836   :  { %1162 = vperm.xlu0 %2106, %v1105_v1   ;;  %2115 = vtanh.f32 %v1105_v1 }
 0x837   :  { %v1109_v4 = vpop.f32.mrb[18].mxu1 }
 0x838   :  { %v1110_v7 = vadd.f32 %v1713_v62, %v1109_v4  ;;  %v1944_v9 = vpop.f32.mrb[19].mxu1  ;;  %v1385_v4 = vld [vmem:[#allocation5 + $0xe8] sm:$0xff] }
 0x83a   :  { %1167 = vperm.xlu1 %2085, %v1110_v7   ;;  %2117 = vtanh.f32 %v1110_v7 }
 0x83b   :  { %v1114_v10 = vpop.f32.mrb[20].mxu1 }
 0x83c   :  { %v1115_v11 = vadd.f32 %v1713_v62, %v1114_v10  ;;  %v1947_v12 = vpop.f32.mrb[21].mxu1  ;;  %v1382_v62 = vld [vmem:[#allocation5 + $0xd0] sm:$0xff]  ;;  %v1387_v10 = vld [vmem:[#allocation5 + $0xf8] sm:$0xff] }
 0x83e   :  { %1172 = vperm.xlu1 %2085, %v1115_v11   ;;  %2119 = vtanh.f32 %v1115_v11 }
 0x840   :  { %v2116_v37 = vpop.eup %2115 }
 0x844   :  { %v2118_v38 = vpop.eup %2117 }
 0x848   :  { %v2120_v55 = vpop.eup %2119 }
 0x854   :  { %1118 = vxpose.xlu0.b32.start [1/3] (short) (narrow) %v1105_v1, 8  ;;  %v1384_v1 = vld [vmem:[#allocation5 + $0xe0] sm:$0xff] }
 0x855   :  { %v2015_v3 = vpack.c.bf16 %v1384_v1, %v1383_v63 }
 0x858   :  { %1119 = vxpose.xlu0.b32.cont [2/3] (short) (narrow) %v1110_v7, 8  ;;  %v1386_v7 = vld [vmem:[#allocation5 + $0xf0] sm:$0xff] }
 0x859   :  { %v2018_v9 = vpack.c.bf16 %v1386_v7, %v1385_v4 }
 0x85c   :  { %1120 = vxpose.xlu0.b32.end [3/3] (short) (narrow) %v1115_v11, 8  ;;  %v1388_v11 = vld [vmem:[#allocation5 + $0x100] sm:$0xff] }
 0x85d   :  { %v2021_v12 = vpack.c.bf16 %v1388_v11, %v1387_v10 }
 0x8b5   :  { %v1163_v6 = vpop.permute.xlu0 %1162 }
 0x8b9   :  { %v1168_v20 = vpop.permute.xlu1 %1167 }
 0x8bd   :  { %v1173_v23 = vpop.permute.xlu1 %1172 }
 0x8d4   :  { %v1134_v21 = vpop.trf.xlu0 }
 0x8d5   :  { %v1159_v22 = vrot.slane %v1134_v21, %v1158_v18 }
 0x8d7   :  { %vm1176_vm8 = vcmp.gt.f32.partialorder %v1159_v22, %v1168_v20  ;;  %vm1179_vm9 = vcmp.eq.f32.partialorder %v1159_v22, %v1168_v20  ;;  %vm1178_vm10 = vcmp.eq.f32.partialorder %v1159_v22, %v1163_v6  ;;  %vm1175_vm13 = vcmp.gt.f32.partialorder %v1159_v22, %v1163_v6  ;;  %v1392_v6 = vld [vmem:[#allocation5 + $0x120] sm:$0xff]  ;;  %v1394_v20 = vld [vmem:[#allocation5 + $0x130] sm:$0xff] }
 0x8d8   :  { %vm1185_vm12 = vmand %vm1179_vm9, %vm1182_vm7  ;;  %vm1180_vm15 = vcmp.eq.f32.partialorder %v1159_v22, %v1173_v23  ;;  %vm1177_vm2 = vcmp.gt.f32.partialorder %v1159_v22, %v1173_v23  ;;  %v2027_v18 = vpack.c.bf16 %v1392_v6, %v1391_v16  ;;  %v2030_v23 = vpack.c.bf16 %v1394_v20, %v1393_v19 }
 0x8d9   :  { %vm1188_vm14 = vmor %vm1176_vm8, %vm1185_vm12 }
 0x8da   :  { %v1191_v24 = vsel %vm1188_vm14, 1, %v2229_v53  ;;  %vm1184_vm0 = vmand %vm1178_vm10, %vm1181_vm11  ;;  %vm1268_vm10 = vcmask 254976  }
 0x8db   :  { %v1206_v26 = vsel %vm251_vm4, %v1191_v24, 0  ;;  %vm1187_vm3 = vmor %vm1175_vm13, %vm1184_vm0  ;;  %v1395_v24 = vld [vmem:[#allocation5 + $0x138] sm:$0xff] }
 0x8dc   :  { %v1208_v27 = vshrl.u32 %v1206_v26, 16  ;;  %v1190_v28 = vsel %vm1187_vm3, 1, %v2229_v53  ;;  %vm1186_vm1 = vmand %vm1180_vm15, %vm1183_vm6  ;;  %vm1219_vm6 = vcmask 140288   ;;  %v1207_v41 = vand.u32 65535, %v1206_v26  ;;  %v1396_v26 = vld [vmem:[#allocation5 + $0x140] sm:$0xff] }
 0x8dd   :  { %v1193_v30 = vsel %vm251_vm4, %v1190_v28, 0  ;;  %vm1189_vm5 = vmor %vm1177_vm2, %vm1186_vm1 }
 0x8de   :  { %v1210_v31 = vcvt.s32.f32 %v1208_v27  ;;  %v1195_v33 = vshrl.u32 %v1193_v30, 16  ;;  %v1194_v35 = vand.u32 65535, %v1193_v30  ;;  %v1192_v39 = vsel %vm1189_vm5, 1, %v2229_v53 }
 0x8df   :  { %v1220_v43 = vsel %vm1219_vm6, %v1192_v39, 0  ;;  %v1209_v45 = vcvt.s32.f32 %v1207_v41  ;;  %v2012_v53 = vpack.c.bf16 %v1382_v62, %v1381_v58  ;;  %vm2627_vm5 = vcmask 261120  }
 0x8e0   :  { %1213 = vadd.xlane.f32.xlu0 %v1210_v31  ;;  %v1197_v34 = vcvt.s32.f32 %v1195_v33  ;;  %v1196_v36 = vcvt.s32.f32 %v1194_v35  ;;  %v1222_v47 = vshrl.u32 %v1220_v43, 16  ;;  %v1221_v51 = vand.u32 65535, %v1220_v43  ;;  %v1397_v33 = vld [vmem:[#allocation5 + $0x148] sm:$0xff]  ;;  %vm2628_vm7 = vmmov %vm2627_vm5 }
 0x8e1   :  { %2013 = vmatpush1.bf16.msra.mxu1 %v2012_v53  ;;  %v2033_v31 = vpack.c.bf16 %v1396_v26, %v1395_v24  ;;  %vm2629_vm8 = vmmov %vm2627_vm5 }
 0x8e2   :  { %1200 = vadd.xlane.f32.xlu1 %v1197_v34  ;;  %v1224_v49 = vcvt.s32.f32 %v1222_v47  ;;  %v1223_v54 = vcvt.s32.f32 %v1221_v51  ;;  %2014 = vmatprep.subr.bf16.mxu1 %v2228_v52  ;;  %v1398_v34 = vld [vmem:[#allocation5 + $0x150] sm:$0xff]  ;;  %vm2630_vm9 = vmmov %vm2627_vm5 }
 0x8e3   :  { %v2036_v39 = vpack.c.bf16 %v1398_v34, %v1397_v33  ;;  %vm2631_vm11 = vmmov %vm2627_vm5 }
 0x8e4   :  { %vm2632_vm12 = vmmov %vm2627_vm5 }
 0x8e5   :  { %2016 = vmatpush1.bf16.msra.mxu1 %v2015_v3  ;;  %vm2633_vm13 = vmmov %vm2627_vm5 }
 0x8e6   :  { %1198 = vadd.xlane.f32.xlu1 %v1196_v36  ;;  %2017 = vmatprep.subr.bf16.mxu1 %v2228_v52  ;;  %vm2634_vm14 = vmmov %vm2627_vm5 }
 0x8e7   :  { %vm2635_vm0 = vmmov %vm2627_vm5 }
 0x8e8   :  { %vm2636_vm2 = vmmov %vm2635_vm0 }
 0x8e9   :  { %2019 = vmatpush1.bf16.msra.mxu1 %v2018_v9  ;;  %vm2637_vm3 = vmmov %vm2635_vm0 }
 0x8ea   :  { %2020 = vmatprep.subr.bf16.mxu1 %v2228_v52  ;;  %vm2638_vm6 = vmmov %vm2635_vm0 }
 0x8ed   :  { %2022 = vmatpush1.bf16.msra.mxu1 %v2021_v12 }
 0x8ee   :  { %2023 = vmatprep.subr.bf16.mxu1 %v2228_v52 }
 0x8f1   :  { %2025 = vmatpush1.bf16.msra.mxu1 %v2024_v15 }
 0x8f2   :  { %2026 = vmatprep.subr.bf16.mxu1 %v2228_v52 }
 0x8f5   :  { %2028 = vmatpush1.bf16.msra.mxu1 %v2027_v18 }
 0x8f6   :  { %2029 = vmatprep.subr.bf16.mxu1 %v2228_v52 }
 0x8f7   :  { %1241 = vperm.xlu1 %2085, %v2116_v37  }
 0x8f9   :  { %2031 = vmatpush1.bf16.msra.mxu1 %v2030_v23 }
 0x8fa   :  { %2032 = vmatprep.subr.bf16.mxu1 %v2228_v52 }
 0x8fb   :  { %1246 = vperm.xlu1 %2085, %v2118_v38  }
 0x8fd   :  { %2034 = vmatpush1.bf16.msra.mxu1 %v2033_v31 }
 0x8fe   :  { %2035 = vmatprep.subr.bf16.mxu1 %v2228_v52 }
 0x901   :  { %2037 = vmatpush1.bf16.msra.mxu1 %v2036_v39 }
 0x902   :  { %2038 = vmatprep.subr.bf16.mxu1 %v2228_v52 }
 0x91f   :  { %1211 = vadd.xlane.f32.xlu1 %v1209_v45 }
 0x923   :  { %1227 = vadd.xlane.f32.xlu1 %v1224_v49 }
 0x927   :  { %1225 = vadd.xlane.f32.xlu1 %v1223_v54 }
 0x938   :  { %1251 = vperm.xlu1 %2085, %v2120_v55  }
 0x96d   :  { %v1214_v45 = vpop.xlane.xlu0 %1213 }
 0x96e   :  { %v1216_v49 = vcvt.f32.s32 %v1214_v45 }
 0x96f   :  { %v1201_v21 = vpop.xlane.xlu1 %1200 }
 0x970   :  { %v1203_v22 = vcvt.f32.s32 %v1201_v21  ;;  %v1217_v54 = vshll.u32 %v1216_v49, 16 }
 0x972   :  { %v1204_v28 = vshll.u32 %v1203_v22, 16 }
 0x973   :  { %v1199_v27 = vpop.xlane.xlu1 %1198 }
 0x974   :  { %v1202_v30 = vcvt.f32.s32 %v1199_v27 }
 0x976   :  { %v1205_v35 = vadd.s32 %v1204_v28, %v1202_v30 }
 0x977   :  { %v1242_v36 = vpop.permute.xlu1 %1241 }
 0x978   :  { %vm1233_vm1 = vcmp.lt.s32.totalorder %v1205_v35, 9  ;;  %v1254_v37 = vmul.f32 %v1242_v36, %v2356_v25  ;;  %v1293_v38 = vmul.f32 %v1242_v36, %v2409_v8  ;;  %v1325_v62 = vmul.f32 %v1242_v36, %v743_v42 }
 0x97a   :  { %v1263_v41 = vsel %vm1233_vm1, %v1254_v37, -1e+30  ;;  %v1310_v43 = vsel %vm1233_vm1, %v1293_v38, 0.0  ;;  %v1278_v61 = vsel %vm1233_vm1, %v1254_v37, 0.0  ;;  %v1296_v3 = vsel %vm1233_vm1, %v1293_v38, -1e+30 }
 0x97b   :  { %v1247_v47 = vpop.permute.xlu1 %1246  ;;  %v1266_v1 = vsel %vm2627_vm5, %v1263_v41, -inf  ;;  %v1313_v4 = vsel %vm2629_vm8, %v1310_v43, 0.0  ;;  %v1281_v19 = vsel %vm2633_vm13, %v1278_v61, 0.0  ;;  %v1299_v20 = vsel %vm2634_vm14, %v1296_v3, -inf  ;;  %v1400_v61 = vld [vmem:[#allocation5 + $0x160] sm:$0xff]  ;;  %vm2641_vm8 = vmmov %vm2635_vm0 }
 0x97c   :  { %v1255_v8 = vmul.f32 %v1247_v47, %v2362_v29  ;;  %v1294_v56 = vmul.f32 %v1247_v47, %v2415_v13  ;;  %v1326_v42 = vmul.f32 %v1247_v47, %v744_v46  ;;  %v1328_v44 = vsel %vm1233_vm1, %v1325_v62, -1e+30 }
 0x97d   :  { %v1342_v46 = vsel %vm1233_vm1, %v1325_v62, 0.0  ;;  %v1331_v41 = vsel %vm2637_vm3, %v1328_v44, -inf  ;;  %vm2639_vm1 = vmmov %vm2635_vm0  ;;  %vm1374_vm5 = vcmask 523264  }
 0x97e   :  { %v1345_v43 = vsel %vm2638_vm6, %v1342_v46, 0.0 }
 0x9ac   :  { %v1212_v51 = vpop.xlane.xlu1 %1211 }
 0x9ad   :  { %v1215_v55 = vcvt.f32.s32 %v1212_v51 }
 0x9af   :  { %v1218_v25 = vadd.s32 %v1217_v54, %v1215_v55 }
 0x9b0   :  { %v1228_v57 = vpop.xlane.xlu1 %1227 }
 0x9b1   :  { %vm1234_vm4 = vcmp.lt.s32.totalorder %v1218_v25, 9  ;;  %v1230_v58 = vcvt.f32.s32 %v1228_v57 }
 0x9b2   :  { %v1264_v53 = vsel %vm1234_vm4, %v1255_v8, -1e+30  ;;  %v1311_v63 = vsel %vm1234_vm4, %v1294_v56, 0.0  ;;  %v1279_v13 = vsel %vm1234_vm4, %v1255_v8, 0.0  ;;  %v1297_v10 = vsel %vm1234_vm4, %v1294_v56, -1e+30 }
 0x9b3   :  { %v1267_v29 = vsel %vm2628_vm7, %v1264_v53, -inf  ;;  %v1314_v40 = vsel %vm2630_vm9, %v1311_v63, 0.0  ;;  %v1231_v11 = vshll.u32 %v1230_v58, 16  ;;  %v1282_v14 = vsel %vm2631_vm11, %v1279_v13, 0.0  ;;  %v1399_v58 = vld [vmem:[#allocation5 + $0x158] sm:$0xff] }
 0x9b4   :  { %v1226_v7 = vpop.xlane.xlu1 %1225  ;;  %v1270_v9 = vmax.f32 %v1266_v1, %v1267_v29  ;;  %v1315_v5 = vadd.f32 %v1314_v40, %v1313_v4  ;;  %v1300_v16 = vsel %vm2632_vm12, %v1297_v10, -inf  ;;  %v1329_v6 = vsel %vm1234_vm4, %v1326_v42, -1e+30  ;;  %v1402_v10 = vld [vmem:[#allocation5 + $0x170] sm:$0xff] }
 0x9b5   :  { %v1229_v12 = vcvt.f32.s32 %v1226_v7  ;;  %v1343_v18 = vsel %vm1234_vm4, %v1326_v42, 0.0  ;;  %v1283_v22 = vadd.f32 %v1282_v14, %v1281_v19  ;;  %v1302_v26 = vmax.f32 %v1299_v20, %v1300_v16  ;;  %vm2640_vm4 = vmmov %vm2635_vm0 }
 0x9b6   :  { %v1332_v27 = vsel %vm2635_vm0, %v1329_v6, -inf  ;;  %v1346_v28 = vsel %vm2636_vm2, %v1343_v18, 0.0  ;;  %v2039_v63 = vpack.c.bf16 %v1400_v61, %v1399_v58  ;;  %v1478_v6 = vld [vmem:[#allocation5 + $0x180] sm:$0xff]  ;;  %v1479_v18 = vld [vmem:[#allocation5 + $0x188] sm:$0xff]  ;;  %vm1376_vm7 = vcmask 785408  }
 0x9b7   :  { %v1232_v15 = vadd.s32 %v1231_v11, %v1229_v12  ;;  %v1334_v49 = vmax.f32 %v1331_v41, %v1332_v27  ;;  %v1347_v51 = vadd.f32 %v1346_v28, %v1345_v43  ;;  %v2045_v20 = vpack.c.bf16 %v1479_v18, %v1478_v6 }
 0x9b8   :  { %v1252_v21 = vpop.permute.xlu1 %1251  ;;  %2040 = vmatpush1.bf16.msra.mxu1 %v2039_v63  ;;  %vm2642_vm9 = vmmov 0   ;;  %v1558_v63 = vld [vmem:[#allocation5 + $0x1b0] sm:$0xff]  ;;  %vm1634_vm11 = vcmask 16384   ;;  %vm244_vm12 = vcmask 139264  }
 0x9b9   :  { %vm1235_vm15 = vcmp.lt.s32.totalorder %v1232_v15, 9  ;;  %v1256_v23 = vmul.f32 %v1252_v21, %v2368_v32  ;;  %v1295_v24 = vmul.f32 %v1252_v21, %v2422_v17  ;;  %v1327_v30 = vmul.f32 %v1252_v21, %v745_v50  ;;  %2041 = vmatprep.subr.bf16.mxu1 %v2228_v52  ;;  %2046 = vmatpush3.bf16.msra.mxu0 %v2045_v20 }
 0x9ba   :  { %2047 = vmatprep.subr.bf16.mxu0 %v2228_v52 }
 0x9bb   :  { %v1265_v31 = vsel %vm1235_vm15, %v1256_v23, -1e+30  ;;  %v1280_v33 = vsel %vm1235_vm15, %v1256_v23, 0.0  ;;  %v1298_v34 = vsel %vm1235_vm15, %v1295_v24, -1e+30  ;;  %v1312_v35 = vsel %vm1235_vm15, %v1295_v24, 0.0 }
 0x9bc   :  { %v1269_v32 = vsel %vm1268_vm10, %v1265_v31, -inf  ;;  %v1284_v17 = vsel %vm1268_vm10, %v1280_v33, 0.0  ;;  %v1301_v36 = vsel %vm1268_vm10, %v1298_v34, -inf  ;;  %v1316_v37 = vsel %vm1268_vm10, %v1312_v35, 0.0 }
 0x9bd   :  { %v2573_v38 = vmax.f32 %v1270_v9, %v1269_v32  ;;  %v1285_v48 = vadd.f32 %v1284_v17, %v1283_v22  ;;  %v1303_v50 = vmax.f32 %v1302_v26, %v1301_v36  ;;  %v1317_v39 = vadd.f32 %v1316_v37, %v1315_v5  ;;  %v1401_v9 = vld [vmem:[#allocation5 + $0x168] sm:$0xff] }
 0x9be   :  { %v1330_v45 = vsel %vm1235_vm15, %v1327_v30, -1e+30  ;;  %v1344_v47 = vsel %vm1235_vm15, %v1327_v30, 0.0  ;;  %v2042_v42 = vpack.c.bf16 %v1402_v10, %v1401_v9 }
 0x9bf   :  { %v1286_v54 = vrot.slane %v1285_v48, 4  ;;  %v1304_v55 = vrot.slane %v1303_v50, 4  ;;  %v1333_v25 = vsel %vm1268_vm10, %v1330_v45, -inf  ;;  %v1348_v8 = vsel %vm1268_vm10, %v1344_v47, 0.0 }
 0x9c0   :  { %v1335_v56 = vmax.f32 %v1334_v49, %v1333_v25  ;;  %v1349_v57 = vadd.f32 %v1348_v8, %v1347_v51  ;;  %2043 = vmatpush1.bf16.msra.mxu1 %v2042_v42  ;;  %v1318_v28 = vrot.slane %v1317_v39, 4  ;;  %v1272_v30 = vrot.slane %v2573_v38, 4  ;;  %v1481_v25 = vld [vmem:[#allocation5 + $0x198] sm:$0xff] }
 0x9c1   :  { %v1305_v62 = vmax.f32 %v1303_v50, %v1304_v55  ;;  %v1287_v53 = vadd.f32 %v1286_v54, %v1285_v48  ;;  %v1480_v55 = vld [vmem:[#allocation5 + $0x190] sm:$0xff]  ;;  %vm1560_vm10 = vcmask 130048  }
 0x9c2   :  { %v1336_v1 = vrot.slane %v1335_v56, 4  ;;  %v1350_v3 = vrot.slane %v1349_v57, 4  ;;  %v1319_v31 = vadd.f32 %v1318_v28, %v1317_v39  ;;  %v1273_v33 = vmax.f32 %v2573_v38, %v1272_v30 }
 0x9c3   :  { %v1306_v29 = vrot.slane %v1305_v62, 2  ;;  %v1288_v13 = vrot.slane %v1287_v53, 2  ;;  %v2048_v8 = vpack.c.bf16 %v1481_v25, %v1480_v55 }
 0x9c4   :  { %v1337_v4 = vmax.f32 %v1335_v56, %v1336_v1  ;;  %v1351_v7 = vadd.f32 %v1350_v3, %v1349_v57  ;;  %v1320_v34 = vrot.slane %v1319_v31, 2  ;;  %v1274_v35 = vrot.slane %v1273_v33, 2  ;;  %v1403_v56 = vld [vmem:[#allocation5 + $0x178] sm:$0x1]  ;;  %v1482_v3 = vld [vmem:[#allocation5 + $0x1a0] sm:$0x1] }
 0x9c5   :  { %v1307_v40 = vmax.f32 %v1305_v62, %v1306_v29  ;;  %v1289_v5 = vadd.f32 %v1288_v13, %v1287_v53  ;;  %2049 = vmatpush3.bf16.msra.mxu0 %v2048_v8  ;;  %v1557_v53 = vld [vmem:[#allocation5 + $0x1a8] sm:$0xff] }
 0x9c6   :  { %v1338_v11 = vrot.slane %v1337_v4, 2  ;;  %v1352_v12 = vrot.slane %v1351_v7, 2  ;;  %v1321_v32 = vadd.f32 %v1320_v34, %v1319_v31  ;;  %v1275_v17 = vmax.f32 %v1273_v33, %v1274_v35  ;;  %2050 = vmatprep.subr.bf16.mxu0 %v2228_v52 }
 0x9c7   :  { %v1308_v14 = vrot.slane %v1307_v40, 1  ;;  %v1290_v21 = vrot.slane %v1289_v5, 1  ;;  %v2051_v1 = vpack.c.bf16 %v1558_v63, %v1557_v53 }
 0x9c8   :  { %v1339_v15 = vmax.f32 %v1337_v4, %v1338_v11  ;;  %v1353_v16 = vadd.f32 %v1352_v12, %v1351_v7  ;;  %v1322_v36 = vrot.slane %v1321_v32, 1  ;;  %v1276_v48 = vrot.slane %v1275_v17, 1  ;;  %v1559_v7 = vld [vmem:[#allocation5 + $0x1b8] sm:$0x1] }
 0x9c9   :  { %v1309_v19 = vmax.f32 %v1307_v40, %v1308_v14  ;;  %v1291_v26 = vadd.f32 %v1290_v21, %v1289_v5 }
 0x9ca   :  { %v1340_v44 = vrot.slane %v1339_v15, 1  ;;  %v1354_v46 = vrot.slane %v1353_v16, 1  ;;  %v1323_v50 = vadd.f32 %v1322_v36, %v1321_v32  ;;  %v1277_v41 = vmax.f32 %v1275_v17, %v1276_v48 }
 0x9cb   :  { %1358 = vrot.lane.b32.xlu1 %v1309_v19, %s2232_s12  ;;  %v1292_v27 = vmul.f32 0.11111111, %v1291_v26 }
 0x9cc   :  { %v1341_v22 = vmax.f32 %v1339_v15, %v1340_v44  ;;  %v1355_v23 = vadd.f32 %v1354_v46, %v1353_v16  ;;  %v1324_v43 = vmul.f32 0.11111111, %v1323_v50 }
 0x9ce   :  { %1362 = vrot.lane.b32.xlu0 %v1341_v22, %s2233_s13  ;;  %v1356_v24 = vmul.f32 0.11111111, %v1355_v23 }
 0x9d0   :  { %1370 = vrot.lane.b32.xlu1 %v1356_v24, %s2232_s12 }
 0x9d4   :  { %1366 = vrot.lane.b32.xlu1 %v1292_v27, %s2234_s14 }
 0xa3d   :  { %v1359_v37 = vpop.permute.xlu1 %1358 }
 0xa3e   :  { %v1373_v49 = vsel %vm2639_vm1, %v1277_v41, %v1359_v37 }
 0xa40   :  { %v1363_v47 = vpop.permute.xlu0 %1362 }
 0xa41   :  { %v1375_v39 = vsel %vm1374_vm5, %v1373_v49, %v1363_v47 }
 0xa42   :  { %v1371_v45 = vpop.permute.xlu1 %1370 }
 0xa43   :  { %v1378_v51 = vsel %vm2640_vm4, %v1324_v43, %v1371_v45 }
 0xa44   :  { %1718 = vmatprep.mubr.msk.f32.mxu1 %vm1374_vm5, %v1378_v51 }
 0xa46   :  { %v1367_v38 = vpop.permute.xlu1 %1366 }
 0xa47   :  { %v1377_v54 = vsel %vm1376_vm7, %v1375_v39, %v1367_v38 }
 0xa48   :  { %1472 = vmatmul.mubr.f32.vlgmr.msra.gmra.mrb[22].mxu1 %v1377_v54 }
 0xb1b   :  { %v1473_v57 = vpop.f32.mrb[22].mxu1 }
 0xb1c   :  { %v1474_v58 = vadd.f32 %v1473_v57, %v1403_v56  ;;  %v1475_v61 = vpop.f32.mrb[23].mxu1 }
 0xb1e   :  { %v1477_v62 = vmax.f32 %v1474_v58, 0.0 }
 0xb20   :  { %1957 = vmatmul.mubr.msk.f32.vlgmr.msra.gmra.mrb[26].mxu0 %vm2641_vm8, %v1477_v62 }
 0xb21   :  { %1963 = vmatprep.mubr.msk.f32.mxu0 %vm2642_vm9, %v2225_v0  ;;  %2052 = vmatpush3.bf16.msra.mxu0 %v2051_v1 }
 0xbf3   :  { %v1552_v29 = vpop.f32.mrb[26].mxu0 }
 0xbf4   :  { %v1553_v13 = vadd.f32 %v1552_v29, %v1482_v3  ;;  %v1958_v4 = vpop.f32.mrb[27].mxu0 }
 0xbf6   :  { %v1556_v52 = vmax.f32 %v1553_v13, 0.0 }
 0xbf8   :  { %1964 = vmatmul.mubr.msk.f32.vlgmr.msra.gmra.mrb[28].mxu0 %vm1560_vm10, %v1556_v52 }
 0xccb   :  { %v1630_v9 = vpop.f32.mrb[28].mxu0 }
 0xccc   :  { %v1631_v10 = vadd.f32 %v1630_v9, %v1559_v7  ;;  %v1965_v40 = vpop.f32.mrb[29].mxu0 }
 0xcce   :  { %v1635_v42 = vsel %vm1634_vm11, %v1631_v10, -inf }
 0xccf   :  { %1636 = vmax.xlane.f32.xlu1 %v1635_v42 }
 0xd02   :  { %212 = vxpose.xlu1.b32.start [1/3] (short) (narrow) %v2320_v59, 8 }
 0xd06   :  { %213 = vxpose.xlu1.b32.cont [2/3] (short) (narrow) %v2322_v60, 8 }
 0xd0a   :  { %214 = vxpose.xlu1.b32.end [3/3] (short) (narrow) %v2326_v2, 8 }
 0xd5c   :  { %v1637_v0 = vpop.xlane.xlu1 %1636 }
 0xd5d   :  { %v1638_v11 = vsub.f32 %v1631_v10, %v1637_v0 }
 0xd5f   :  { %v1639_v12 = vmul.f32 1.442695, %v1638_v11 }
 0xd61   :  { %2121 = vpow2.f32 %v1639_v12 }
 0xd6b   :  { %v2122_v5 = vpop.eup %2121 }
 0xd6c   :  { %v1641_v14 = vsel %vm1634_vm11, %v2122_v5, 0.0 }
 0xd6d   :  { %1642 = vadd.xlane.f32.xlu0 %v1641_v14 }
 0xd82   :  { %v228_v15 = vpop.trf.xlu1 }
 0xd83   :  { %245 = vst.msk [vmem:[#allocation8] sm:$0x1] %vm244_vm12, %v228_v15 }
 0xd84   :  { %2180 = shalt.err (!%p2177_p6)
}
 0xd85   :  { %s2181_s21 = scalar_lea.hbm %s2624_s3, 16 }
 0xd86   :  { %p2182_p7 = scmp.ne.s32.totalorder %s2624_s3, %s2181_s21  ;;  %p2185_p8 = scmp.lt.u32.totalorder %s2181_s21, %s2624_s3 }
 0xd88   :  { %p2187_p9 = pnand %p2185_p8, %p2182_p7 }
 0xd8a   :  { %2190 = shalt.err (!%p2187_p9)
}
 0xd8b   :  { %1667 = dma.vmem_to_hbm [thread:$0]  %s1665_s16, 16, %s2624_s3, [#allocation9]  }
 0xd8c   :  { %s2236_s28 = smov [#allocation7]  }
 0xd8d   :  { %s1654_s29 = sshll.u32 %s2236_s28, 4  ;;  %s1655_s29 = int_to_ptr.vmem [resolvable:$true] %s1654_s29 }
 0xd8e   :  { %s2191_s30 = scalar_lea.vmem %s1655_s29, 16  ;;  %s2195_s4 = scalar_lea.vmem %s1655_s29, 32 }
 0xd8f   :  { %p2192_p10 = scmp.ne.s32.totalorder %s1655_s29, %s2191_s30  ;;  %p2196_p11 = scmp.lt.s32.totalorder %s1655_s29, %s1655_s29 }
 0xd90   :  { %p2197_p12 = scmp.lt.s32.totalorder %s2195_s4, %s2191_s30 }
 0xd92   :  { %p2198_p13 = por %p2197_p12, %p2196_p11 }
 0xd94   :  { %p2199_p0 = pnand %p2198_p13, %p2192_p10 }
 0xdfa   :  { %v1643_v59 = vpop.xlane.xlu0 %1642 }
 0xdfb   :  { %2123 = vlog2.f32 %v1643_v59 }
 0xe05   :  { %v2124_v60 = vpop.eup %2123 }
 0xe06   :  { %v1645_v2 = vmul.f32 0.6931472, %v2124_v60 }
 0xe08   :  { %v1646_v16 = vsub.f32 %v1638_v11, %v1645_v2 }
 0xe0a   :  { %1647 = vst.msk [vmem:[#allocation7] sm:$0x1] %vm1634_vm11, %v1646_v16 }
 0xe0b   :  { %2202 = shalt.err (!%p2199_p0)
}
 0xe0c   :  { %s2203_s6 = scalar_lea.hbm %s2623_s2, 16 }
 0xe0d   :  { %p2204_p1 = scmp.ne.s32.totalorder %s2623_s2, %s2203_s6  ;;  %p2207_p2 = scmp.lt.u32.totalorder %s2203_s6, %s2623_s2 }
 0xe0f   :  { %p2209_p3 = pnand %p2207_p2, %p2204_p1 }
 0xe11   :  { %2212 = shalt.err (!%p2209_p3)
}
 0xe12   :  { %1657 = dma.vmem_to_hbm [thread:$0]  %s1655_s29, 16, %s2623_s2, [#allocation4]  }
 0xe13   :  { %2217 = dma.done.wait [#allocation4], 16  }
 0xe14   :  { %2218 = vsyncadd [#allocation4], 4294967280 }
 0xe15   :  { %2219 = dma.done.wait [#allocation9], 16  }
 0xe16   :  { %2220 = vsyncadd [#allocation9], 4294967280 }
 0xe17   :  { %1674 = vsyncpa [#allocation3], 1 }
 0xe18   :  { %1675 = vsyncpa [#allocation6], 1 }
 0xe19   :  { %1676 = vsyncpa [#allocation4], 1 }
 0xe1a   :  { %1677 = vsyncpa [#allocation9], 1 }

</bundles_post_ra>
